<compile_context>
chip_gen: v6e
topology: v6e:2x2x1
jax: 0.10.0
libtpu: 0.0.40
codegen_flags: <defaults>
</compile_context>

<pallas_src>
import functools

import jax
import jax.numpy as jnp
from jax import lax
from jax.experimental import pallas as pl
from jax.experimental.pallas import tpu as pltpu

_MM_DTYPE = jnp.bfloat16  # MXU operand dtype; accumulation is always f32.


def _esa_kernel(x_ref, xkv_ref, wq_ref, bq_ref, wk_ref, bk_ref, wv_ref, bv_ref,
                gamma_ref, o_ref, q_scr, m_scr, l_scr, acc_scr, *, scale):
    """Grid = (batch, query tile, kv tile); the kv axis is the reduction.

    x_ref   : (1, C, TQ)    query source, channels-first (f32)
    xkv_ref : (1, TKV, C)   key/value source, channels-last (f32)
    wq/wk   : (Cqkp, C)     1x1-conv weights (out, in), zero-padded rows, bf16
    wv      : (C, C)        bf16
    bq      : (Cqkp, 1)     bk : (1, Cqkp)     bv : (C, 1)     (f32)
    gamma   : (1, 1)
    o_ref   : (1, C, TQ)
    scratch : q_scr (Cqkp, TQ), m/l (1, TQ), acc (C, TQ)  -- all f32
    """
    ki = pl.program_id(2)

    @pl.when(ki == 0)
    def _init():
        x = x_ref[0].astype(wq_ref.dtype)                              # (C, TQ)
        q = lax.dot_general(wq_ref[...], x, (((1,), (0,)), ((), ())),
                            preferred_element_type=jnp.float32)        # (Cqkp, TQ)
        q_scr[...] = (q + bq_ref[...]) * scale                         # scale folded into q
        m_scr[...] = jnp.full_like(m_scr, -jnp.inf)
        l_scr[...] = jnp.zeros_like(l_scr)
        acc_scr[...] = jnp.zeros_like(acc_scr)

    xkv = xkv_ref[0].astype(wk_ref.dtype)                              # (TKV, C)
    # k^T : (TKV, Cqkp)  and  v : (C, TKV)  -- NT contractions, MXU-direct.
    kt = lax.dot_general(xkv, wk_ref[...], (((1,), (1,)), ((), ())),
                         preferred_element_type=jnp.float32) + bk_ref[...]
    v = lax.dot_general(wv_ref[...], xkv, (((1,), (1,)), ((), ())),
                        preferred_element_type=jnp.float32) + bv_ref[...]

    # energy (TKV, TQ) = k^T @ q ; softmax runs over the TKV (sublane) axis.
    energy = lax.dot_general(kt.astype(wk_ref.dtype),
                             q_scr[...].astype(wq_ref.dtype),
                             (((1,), (0,)), ((), ())),
                             preferred_element_type=jnp.float32)

    m_prev = m_scr[...]                                                # (1, TQ)
    m_new = jnp.maximum(m_prev, jnp.max(energy, axis=0, keepdims=True))
    alpha = jnp.exp(m_prev - m_new)                                    # (1, TQ)
    p = jnp.exp(energy - m_new)                                        # (TKV, TQ)
    l_scr[...] = alpha * l_scr[...] + jnp.sum(p, axis=0, keepdims=True)
    pv = lax.dot_general(v.astype(wv_ref.dtype), p.astype(wv_ref.dtype),
                         (((1,), (0,)), ((), ())),
                         preferred_element_type=jnp.float32)           # (C, TQ)
    acc_scr[...] = alpha * acc_scr[...] + pv
    m_scr[...] = m_new

    @pl.when(ki == pl.num_programs(2) - 1)
    def _finalize():
        inv_l = pl.reciprocal(l_scr[...], approx=True)                 # (1, TQ), EUP
        out = gamma_ref[0, 0] * (acc_scr[...] * inv_l) + x_ref[0]      # (C, TQ)
        o_ref[0] = out.astype(o_ref.dtype)


def _avg_pool_nchw(x, f):
    """AvgPool2d(kernel=f, stride=f) on NCHW via reshape+mean (glue, not hot path)."""
    # TODO(synk): torch AvgPool2d floors non-divisible spatial dims; this assumes H, W % f == 0.
    B, C, H, W = x.shape
    return x.reshape(B, C, H // f, f, W // f, f).mean(axis=(3, 5))


def _pick_tile(n, target, granules):
    """Largest t <= target dividing n with t % g == 0 for some granule g; else n."""
    if n <= target:
        return n
    for g in granules:
        t = (target // g) * g
        while t >= g:
            if n % t == 0:
                return t
            t -= g
    return n


@functools.partial(jax.jit, static_argnames=("downsample_factor",))
def efficient_self_attention(x_nchw, params, downsample_factor=1):
    """x_nchw: (B, C, H, W). params in PyTorch Conv2d layout (see init_params)."""
    B, C, H, W = x_nchw.shape
    N = H * W

    x_kv = _avg_pool_nchw(x_nchw, downsample_factor) if downsample_factor > 1 else x_nchw
    Nk = x_kv.shape[2] * x_kv.shape[3]

    # Queries / output: channels-first, reshape only (no HBM transpose round trip).
    x_cf = x_nchw.reshape(B, C, N)                                     # (B, C, N)
    # KV source: channels-last so all in-kernel matmuls are transpose-free.
    xkv_cl = jnp.transpose(x_kv.reshape(B, C, Nk), (0, 2, 1))          # (B, Nk, C)

    wq, bq, wk, bk, wv, bv, gamma = params
    Cqk = wq.shape[0]                                   # torch: float(key.shape[1])**-0.5
    scale = float(Cqk) ** -0.5

    # Zero-pad query/key channels to a sublane multiple (zero rows add 0 to q.k).
    Cqkp = max(8, ((Cqk + 7) // 8) * 8)
    pad = Cqkp - Cqk
    mmd = _MM_DTYPE
    wq_p = jnp.pad(wq, ((0, pad), (0, 0))).astype(mmd)                 # (Cqkp, C)
    wk_p = jnp.pad(wk, ((0, pad), (0, 0))).astype(mmd)                 # (Cqkp, C)
    wv_m = wv.astype(mmd)                                              # (C, C)
    bq_c = jnp.pad(bq, (0, pad)).reshape(Cqkp, 1).astype(jnp.float32)
    bk_r = jnp.pad(bk, (0, pad)).reshape(1, Cqkp).astype(jnp.float32)
    bv_c = bv.reshape(C, 1).astype(jnp.float32)
    gamma2 = jnp.asarray(gamma, jnp.float32).reshape(1, 1)

    # TQ rides the lane axis of x/out blocks -> multiple of 128 (or full N);
    # TKV is the sublane axis of the xkv block -> multiple of 8 (or full Nk).
    TQ = _pick_tile(N, 512, (128,))
    TKV = _pick_tile(Nk, 512, (128, 8))
    grid = (B, N // TQ, Nk // TKV)

    # Explicit scoped-VMEM budget: double-buffered tiles + scratch + intermediates.
    f32b = 4
    tiles = 2 * (C * TQ * f32b) + 2 * (TKV * C * f32b) + 2 * (C * TQ * f32b)
    weights = 2 * ((2 * Cqkp * C + C * C) * 2 + (2 * Cqkp + C + 1) * f32b)
    scratch = (Cqkp * TQ + 2 * TQ + C * TQ) * f32b
    interm = (2 * TKV * TQ + 2 * TKV * max(C, Cqkp) + 2 * C * TQ) * f32b
    vmem_limit = int(min(56 * 2 ** 20,
                         max(16 * 2 ** 20, 2 * (tiles + weights + scratch + interm))))

    kernel = functools.partial(_esa_kernel, scale=scale)

    out_cf = pl.pallas_call(
        kernel,
        out_shape=jax.ShapeDtypeStruct((B, C, N), x_nchw.dtype),
        grid_spec=pltpu.PrefetchScalarGridSpec(
            num_scalar_prefetch=0,
            grid=grid,
            in_specs=[
                pl.BlockSpec((1, C, TQ), lambda b, qi, ki: (b, 0, qi)),
                pl.BlockSpec((1, TKV, C), lambda b, qi, ki: (b, ki, 0)),
                pl.BlockSpec((Cqkp, C), lambda b, qi, ki: (0, 0)),
                pl.BlockSpec((Cqkp, 1), lambda b, qi, ki: (0, 0)),
                pl.BlockSpec((Cqkp, C), lambda b, qi, ki: (0, 0)),
                pl.BlockSpec((1, Cqkp), lambda b, qi, ki: (0, 0)),
                pl.BlockSpec((C, C), lambda b, qi, ki: (0, 0)),
                pl.BlockSpec((C, 1), lambda b, qi, ki: (0, 0)),
                pl.BlockSpec((1, 1), lambda b, qi, ki: (0, 0)),
            ],
            out_specs=pl.BlockSpec((1, C, TQ), lambda b, qi, ki: (b, 0, qi)),
            scratch_shapes=[
                pltpu.VMEM((Cqkp, TQ), jnp.float32),   # q (scale folded in)
                pltpu.VMEM((1, TQ), jnp.float32),      # running max  m
                pltpu.VMEM((1, TQ), jnp.float32),      # running sum  l
                pltpu.VMEM((C, TQ), jnp.float32),      # running numerator acc
            ],
        ),
        compiler_params=pltpu.CompilerParams(
            dimension_semantics=("parallel", "parallel", "arbitrary"),
            vmem_limit_bytes=vmem_limit,
        ),
    )(x_cf, xkv_cl, wq_p, bq_c, wk_p, bk_r, wv_m, bv_c, gamma2)

    return out_cf.reshape(B, C, H, W)


def init_params(key, in_dim, gamma_value=0.0):
    """Parameters in PyTorch Conv2d layout (1x1 kernels squeezed):
      query_conv / key_conv : weight (C//8, C), bias (C//8,)
      value_conv            : weight (C, C),    bias (C,)
      gamma                 : (1,)  (0 at init, like the module)."""
    c_qk = in_dim // 8
    k1, k2, k3, k4, k5, k6 = jax.random.split(key, 6)
    s = 1.0 / jnp.sqrt(jnp.float32(in_dim))
    wq = jax.random.uniform(k1, (c_qk, in_dim), jnp.float32, -s, s)
    bq = jax.random.uniform(k2, (c_qk,), jnp.float32, -s, s)
    wk = jax.random.uniform(k3, (c_qk, in_dim), jnp.float32, -s, s)
    bk = jax.random.uniform(k4, (c_qk,), jnp.float32, -s, s)
    wv = jax.random.uniform(k5, (in_dim, in_dim), jnp.float32, -s, s)
    bv = jax.random.uniform(k6, (in_dim,), jnp.float32, -s, s)
    gamma = jnp.full((1,), gamma_value, jnp.float32)
    return (wq, bq, wk, bk, wv, bv, gamma)


def _reference(x_nchw, params, downsample_factor=1):
    """Plain-JAX f32 reference matching the PyTorch forward, for validation."""
    wq, bq, wk, bk, wv, bv, gamma = params
    B, C, H, W = x_nchw.shape
    x_kv = _avg_pool_nchw(x_nchw, downsample_factor) if downsample_factor > 1 else x_nchw
    Nk = x_kv.shape[2] * x_kv.shape[3]
    N = H * W
    xf = jnp.transpose(x_nchw.reshape(B, C, N), (0, 2, 1))             # (B, N, C)
    xkf = jnp.transpose(x_kv.reshape(B, C, Nk), (0, 2, 1))             # (B, Nk, C)
    q = xf @ wq.T + bq
    k = xkf @ wk.T + bk
    v = xkf @ wv.T + bv
    scale = float(wq.shape[0]) ** -0.5
    attn = jax.nn.softmax(jnp.einsum("bnc,bmc->bnm", q, k) * scale, axis=-1)
    out = jnp.einsum("bnm,bmc->bnc", attn, v)
    res = gamma[0] * out + xf
    return jnp.transpose(res, (0, 2, 1)).reshape(B, C, H, W)


if __name__ == "__main__":
    key = jax.random.PRNGKey(0)
    kx, kp, kx2 = jax.random.split(key, 3)

    B, C, H, W = 2, 16, 16, 16          # in_dim=16 -> query/key channels = 2
    x = jax.random.normal(kx, (B, C, H, W), jnp.float32)

    # Module-faithful init: gamma = 0 -> output equals the input exactly.
    params = init_params(kp, C, gamma_value=0.0)
    y0 = efficient_self_attention(x, params, downsample_factor=1)
    jax.block_until_ready(y0)
    assert jnp.allclose(y0, x, atol=1e-6, rtol=0.0)

    # Non-zero gamma: full attention path and the downsample path.
    # (bf16 MXU operands + approx reciprocal -> compare against f32 ref with loose tol.)
    params_nz = params[:-1] + (jnp.full((1,), 0.7, jnp.float32),)
    y1 = efficient_self_attention(x, params_nz, downsample_factor=1)
    y2 = efficient_self_attention(x, params_nz, downsample_factor=2)
    jax.block_until_ready((y1, y2))
    assert jnp.allclose(y1, _reference(x, params_nz, 1), atol=2e-2, rtol=2e-2)
    assert jnp.allclose(y2, _reference(x, params_nz, 2), atol=2e-2, rtol=2e-2)

    # Larger case: multiple query tiles and multiple streamed KV tiles (flash path).
    B2, C2, H2, W2 = 1, 16, 32, 32      # N = Nk = 1024 -> 2x2 (TQ=512, TKV=512) tiles
    x2 = jax.random.normal(kx2, (B2, C2, H2, W2), jnp.float32)
    params2 = init_params(jax.random.fold_in(kp, 1), C2, gamma_value=0.5)
    y3 = efficient_self_attention(x2, params2, downsample_factor=1)
    jax.block_until_ready(y3)
    assert jnp.allclose(y3, _reference(x2, params2, 1), atol=2e-2, rtol=2e-2)

    print("KERNEL_OK")
</pallas_src>

<mosaic_0001>
module attributes {stable_mosaic.version = 11 : i64} {
  func.func @_esa_kernel(%arg0: i32, %arg1: i32, %arg2: i32, %arg3: memref<1x16x256xf32, #tpu.memory_space<vmem>>, %arg4: memref<1x256x16xf32, #tpu.memory_space<vmem>>, %arg5: memref<8x16xbf16, #tpu.memory_space<vmem>>, %arg6: memref<8x1xf32, #tpu.memory_space<vmem>>, %arg7: memref<8x16xbf16, #tpu.memory_space<vmem>>, %arg8: memref<1x8xf32, #tpu.memory_space<vmem>>, %arg9: memref<16x16xbf16, #tpu.memory_space<vmem>>, %arg10: memref<16x1xf32, #tpu.memory_space<vmem>>, %arg11: memref<1x1xf32, #tpu.memory_space<vmem>>, %arg12: memref<1x16x256xf32, #tpu.memory_space<vmem>>, %arg13: memref<8x256xf32, #tpu.memory_space<vmem>>, %arg14: memref<1x256xf32, #tpu.memory_space<vmem>>, %arg15: memref<1x256xf32, #tpu.memory_space<vmem>>, %arg16: memref<16x256xf32, #tpu.memory_space<vmem>>) attributes {dimension_semantics = [#tpu.dimension_semantics<parallel>, #tpu.dimension_semantics<parallel>, #tpu.dimension_semantics<arbitrary>], iteration_bounds = array<i64: 2, 1, 1>, scalar_prefetch = 0 : i64, scratch_operands = 4 : i64, tpu.core_type = #tpu.core_type<tc>, window_params = [{transform_indices = @transform_0, window_bounds = array<i64: 1, 16, 256>}, {transform_indices = @transform_1, window_bounds = array<i64: 1, 256, 16>}, {pipeline_mode = #tpu.pipeline_mode<synchronous>, transform_indices = @transform_2, window_bounds = array<i64: 8, 16>}, {pipeline_mode = #tpu.pipeline_mode<synchronous>, transform_indices = @transform_3, window_bounds = array<i64: 8, 1>}, {pipeline_mode = #tpu.pipeline_mode<synchronous>, transform_indices = @transform_4, window_bounds = array<i64: 8, 16>}, {pipeline_mode = #tpu.pipeline_mode<synchronous>, transform_indices = @transform_5, window_bounds = array<i64: 1, 8>}, {pipeline_mode = #tpu.pipeline_mode<synchronous>, transform_indices = @transform_6, window_bounds = array<i64: 16, 16>}, {pipeline_mode = #tpu.pipeline_mode<synchronous>, transform_indices = @transform_7, window_bounds = array<i64: 16, 1>}, {pipeline_mode = #tpu.pipeline_mode<synchronous>, transform_indices = @transform_8, window_bounds = array<i64: 1, 1>}, {transform_indices = @transform_9, window_bounds = array<i64: 1, 16, 256>}]} {
    %c0_i32 = arith.constant 0 : i32
    %0 = arith.cmpi eq, %arg2, %c0_i32 : i32
    %1 = arith.extui %0 : i1 to i32
    %c0_i32_0 = arith.constant 0 : i32
    %2 = arith.cmpi ne, %1, %c0_i32_0 : i32
    scf.if %2 {
      %c0_32 = arith.constant 0 : index
      %c0_33 = arith.constant 0 : index
      %c0_34 = arith.constant 0 : index
      %47 = vector.load %arg3[%c0_32, %c0_33, %c0_34] : memref<1x16x256xf32, #tpu.memory_space<vmem>>, vector<1x16x256xf32>
      %48 = vector.shape_cast %47 : vector<1x16x256xf32> to vector<16x256xf32>
      %49 = arith.truncf %48 : vector<16x256xf32> to vector<16x256xbf16>
      %c0_35 = arith.constant 0 : index
      %c0_36 = arith.constant 0 : index
      %50 = vector.load %arg5[%c0_35, %c0_36] : memref<8x16xbf16, #tpu.memory_space<vmem>>, vector<8x16xbf16>
      %cst_37 = arith.constant dense<0.000000e+00> : vector<8x256xf32>
      %51 = tpu.matmul %50, %49, %cst_37 {dimension_numbers = #tpu.dot_dimension_numbers<[1], [0], [0], [1], [0, 0, 1, 1], [], []>} : vector<8x16xbf16>, vector<16x256xbf16>, vector<8x256xf32> -> vector<8x256xf32>
      %c0_38 = arith.constant 0 : index
      %c0_39 = arith.constant 0 : index
      %52 = vector.load %arg6[%c0_38, %c0_39] : memref<8x1xf32, #tpu.memory_space<vmem>>, vector<8x1xf32>
      %53 = vector.broadcast %52 : vector<8x1xf32> to vector<8x256xf32>
      %54 = arith.addf %51, %53 : vector<8x256xf32>
      %cst_40 = arith.constant 0.707106769 : f32
      %55 = vector.broadcast %cst_40 : f32 to vector<8x256xf32>
      %56 = arith.mulf %54, %55 : vector<8x256xf32>
      %c0_41 = arith.constant 0 : index
      %c0_42 = arith.constant 0 : index
      %57 = vector.load %arg13[%c0_41, %c0_42] : memref<8x256xf32, #tpu.memory_space<vmem>>, vector<8x256xf32>
      tpu.vector_store %arg13[%c0_41, %c0_42], %56 {strides = array<i32>} : memref<8x256xf32, #tpu.memory_space<vmem>>, vector<8x256xf32>,
      %cst_43 = arith.constant 0xFF800000 : f32
      %58 = vector.broadcast %cst_43 : f32 to vector<1x256xf32>
      %c0_44 = arith.constant 0 : index
      %c0_45 = arith.constant 0 : index
      %59 = vector.load %arg14[%c0_44, %c0_45] : memref<1x256xf32, #tpu.memory_space<vmem>>, vector<1x256xf32>
      tpu.vector_store %arg14[%c0_44, %c0_45], %58 {strides = array<i32>} : memref<1x256xf32, #tpu.memory_space<vmem>>, vector<1x256xf32>,
      %cst_46 = arith.constant 0.000000e+00 : f32
      %60 = vector.broadcast %cst_46 : f32 to vector<1x256xf32>
      %c0_47 = arith.constant 0 : index
      %c0_48 = arith.constant 0 : index
      %61 = vector.load %arg15[%c0_47, %c0_48] : memref<1x256xf32, #tpu.memory_space<vmem>>, vector<1x256xf32>
      tpu.vector_store %arg15[%c0_47, %c0_48], %60 {strides = array<i32>} : memref<1x256xf32, #tpu.memory_space<vmem>>, vector<1x256xf32>,
      %cst_49 = arith.constant 0.000000e+00 : f32
      %62 = vector.broadcast %cst_49 : f32 to vector<16x256xf32>
      %c0_50 = arith.constant 0 : index
      %c0_51 = arith.constant 0 : index
      %63 = vector.load %arg16[%c0_50, %c0_51] : memref<16x256xf32, #tpu.memory_space<vmem>>, vector<16x256xf32>
      tpu.vector_store %arg16[%c0_50, %c0_51], %62 {strides = array<i32>} : memref<16x256xf32, #tpu.memory_space<vmem>>, vector<16x256xf32>,
    } else {
    }
    %c0 = arith.constant 0 : index
    %c0_1 = arith.constant 0 : index
    %c0_2 = arith.constant 0 : index
    %3 = vector.load %arg4[%c0, %c0_1, %c0_2] : memref<1x256x16xf32, #tpu.memory_space<vmem>>, vector<1x256x16xf32>
    %4 = vector.shape_cast %3 : vector<1x256x16xf32> to vector<256x16xf32>
    %5 = arith.truncf %4 : vector<256x16xf32> to vector<256x16xbf16>
    %c0_3 = arith.constant 0 : index
    %c0_4 = arith.constant 0 : index
    %6 = vector.load %arg7[%c0_3, %c0_4] : memref<8x16xbf16, #tpu.memory_space<vmem>>, vector<8x16xbf16>
    %cst = arith.constant dense<0.000000e+00> : vector<256x8xf32>
    %7 = tpu.matmul %5, %6, %cst {dimension_numbers = #tpu.dot_dimension_numbers<[1], [1], [0], [0], [0, 0, 1, 0], [], []>} : vector<256x16xbf16>, vector<8x16xbf16>, vector<256x8xf32> -> vector<256x8xf32>
    %c0_5 = arith.constant 0 : index
    %c0_6 = arith.constant 0 : index
    %8 = vector.load %arg8[%c0_5, %c0_6] : memref<1x8xf32, #tpu.memory_space<vmem>>, vector<1x8xf32>
    %9 = vector.broadcast %8 : vector<1x8xf32> to vector<256x8xf32>
    %10 = arith.addf %7, %9 : vector<256x8xf32>
    %c0_7 = arith.constant 0 : index
    %c0_8 = arith.constant 0 : index
    %11 = vector.load %arg9[%c0_7, %c0_8] : memref<16x16xbf16, #tpu.memory_space<vmem>>, vector<16x16xbf16>
    %cst_9 = arith.constant dense<0.000000e+00> : vector<16x256xf32>
    %12 = tpu.matmul %11, %5, %cst_9 {dimension_numbers = #tpu.dot_dimension_numbers<[1], [1], [0], [0], [0, 0, 1, 0], [], []>} : vector<16x16xbf16>, vector<256x16xbf16>, vector<16x256xf32> -> vector<16x256xf32>
    %c0_10 = arith.constant 0 : index
    %c0_11 = arith.constant 0 : index
    %13 = vector.load %arg10[%c0_10, %c0_11] : memref<16x1xf32, #tpu.memory_space<vmem>>, vector<16x1xf32>
    %14 = vector.broadcast %13 : vector<16x1xf32> to vector<16x256xf32>
    %15 = arith.addf %12, %14 : vector<16x256xf32>
    %16 = arith.truncf %10 : vector<256x8xf32> to vector<256x8xbf16>
    %c0_12 = arith.constant 0 : index
    %c0_13 = arith.constant 0 : index
    %17 = vector.load %arg13[%c0_12, %c0_13] : memref<8x256xf32, #tpu.memory_space<vmem>>, vector<8x256xf32>
    %18 = arith.truncf %17 : vector<8x256xf32> to vector<8x256xbf16>
    %cst_14 = arith.constant dense<0.000000e+00> : vector<256x256xf32>
    %19 = tpu.matmul %16, %18, %cst_14 {dimension_numbers = #tpu.dot_dimension_numbers<[1], [0], [0], [1], [0, 0, 1, 1], [], []>} : vector<256x8xbf16>, vector<8x256xbf16>, vector<256x256xf32> -> vector<256x256xf32>
    %c0_15 = arith.constant 0 : index
    %c0_16 = arith.constant 0 : index
    %20 = vector.load %arg14[%c0_15, %c0_16] : memref<1x256xf32, #tpu.memory_space<vmem>>, vector<1x256xf32>
    %cst_17 = arith.constant dense<0xFF800000> : vector<256xf32>
    %21 = vector.multi_reduction <maximumf>, %19, %cst_17 [0] : vector<256x256xf32> to vector<256xf32>
    %22 = vector.shape_cast %21 : vector<256xf32> to vector<1x256xf32>
    %23 = arith.maximumf %20, %22 : vector<1x256xf32>
    %24 = arith.subf %20, %23 : vector<1x256xf32>
    %25 = math.exp %24 : vector<1x256xf32>
    %26 = vector.broadcast %23 : vector<1x256xf32> to vector<256x256xf32>
    %27 = arith.subf %19, %26 : vector<256x256xf32>
    %28 = math.exp %27 : vector<256x256xf32>
    %c0_18 = arith.constant 0 : index
    %c0_19 = arith.constant 0 : index
    %29 = vector.load %arg15[%c0_18, %c0_19] : memref<1x256xf32, #tpu.memory_space<vmem>>, vector<1x256xf32>
    %30 = arith.mulf %25, %29 : vector<1x256xf32>
    %cst_20 = arith.constant dense<0.000000e+00> : vector<256xf32>
    %31 = vector.multi_reduction <add>, %28, %cst_20 [0] : vector<256x256xf32> to vector<256xf32>
    %32 = vector.shape_cast %31 : vector<256xf32> to vector<1x256xf32>
    %33 = arith.addf %30, %32 : vector<1x256xf32>
    %c0_21 = arith.constant 0 : index
    %c0_22 = arith.constant 0 : index
    %34 = vector.load %arg15[%c0_21, %c0_22] : memref<1x256xf32, #tpu.memory_space<vmem>>, vector<1x256xf32>
    tpu.vector_store %arg15[%c0_21, %c0_22], %33 {strides = array<i32>} : memref<1x256xf32, #tpu.memory_space<vmem>>, vector<1x256xf32>,
    %35 = arith.truncf %15 : vector<16x256xf32> to vector<16x256xbf16>
    %36 = arith.truncf %28 : vector<256x256xf32> to vector<256x256xbf16>
    %cst_23 = arith.constant dense<0.000000e+00> : vector<16x256xf32>
    %37 = tpu.matmul %35, %36, %cst_23 {dimension_numbers = #tpu.dot_dimension_numbers<[1], [0], [0], [1], [0, 0, 1, 1], [], []>} : vector<16x256xbf16>, vector<256x256xbf16>, vector<16x256xf32> -> vector<16x256xf32>
    %c0_24 = arith.constant 0 : index
    %c0_25 = arith.constant 0 : index
    %38 = vector.load %arg16[%c0_24, %c0_25] : memref<16x256xf32, #tpu.memory_space<vmem>>, vector<16x256xf32>
    %39 = vector.broadcast %25 : vector<1x256xf32> to vector<16x256xf32>
    %40 = arith.mulf %39, %38 : vector<16x256xf32>
    %41 = arith.addf %40, %37 : vector<16x256xf32>
    %c0_26 = arith.constant 0 : index
    %c0_27 = arith.constant 0 : index
    %42 = vector.load %arg16[%c0_26, %c0_27] : memref<16x256xf32, #tpu.memory_space<vmem>>, vector<16x256xf32>
    tpu.vector_store %arg16[%c0_26, %c0_27], %41 {strides = array<i32>} : memref<16x256xf32, #tpu.memory_space<vmem>>, vector<16x256xf32>,
    %c0_28 = arith.constant 0 : index
    %c0_29 = arith.constant 0 : index
    %43 = vector.load %arg14[%c0_28, %c0_29] : memref<1x256xf32, #tpu.memory_space<vmem>>, vector<1x256xf32>
    tpu.vector_store %arg14[%c0_28, %c0_29], %23 {strides = array<i32>} : memref<1x256xf32, #tpu.memory_space<vmem>>, vector<1x256xf32>,
    %c0_i32_30 = arith.constant 0 : i32
    %44 = arith.cmpi eq, %arg2, %c0_i32_30 : i32
    %45 = arith.extui %44 : i1 to i32
    %c0_i32_31 = arith.constant 0 : i32
    %46 = arith.cmpi ne, %45, %c0_i32_31 : i32
    scf.if %46 {
      %c0_32 = arith.constant 0 : index
      %c0_33 = arith.constant 0 : index
      %47 = vector.load %arg15[%c0_32, %c0_33] : memref<1x256xf32, #tpu.memory_space<vmem>>, vector<1x256xf32>
      %48 = tpu.reciprocal %47 {approx = true} : vector<1x256xf32> -> vector<1x256xf32>
      %c0_34 = arith.constant 0 : index
      %c0_35 = arith.constant 0 : index
      %49 = vector.load %arg11[%c0_34, %c0_35] : memref<1x1xf32, #tpu.memory_space<vmem>>, vector<1x1xf32>
      %50 = vector.extract %49[0, 0] : f32 from vector<1x1xf32>
      %c0_36 = arith.constant 0 : index
      %c0_37 = arith.constant 0 : index
      %51 = vector.load %arg16[%c0_36, %c0_37] : memref<16x256xf32, #tpu.memory_space<vmem>>, vector<16x256xf32>
      %52 = vector.broadcast %48 : vector<1x256xf32> to vector<16x256xf32>
      %53 = arith.mulf %51, %52 : vector<16x256xf32>
      %54 = vector.broadcast %50 : f32 to vector<16x256xf32>
      %55 = arith.mulf %54, %53 : vector<16x256xf32>
      %c0_38 = arith.constant 0 : index
      %c0_39 = arith.constant 0 : index
      %c0_40 = arith.constant 0 : index
      %56 = vector.load %arg3[%c0_38, %c0_39, %c0_40] : memref<1x16x256xf32, #tpu.memory_space<vmem>>, vector<1x16x256xf32>
      %57 = vector.shape_cast %56 : vector<1x16x256xf32> to vector<16x256xf32>
      %58 = arith.addf %55, %57 : vector<16x256xf32>
      %c0_41 = arith.constant 0 : index
      %c0_42 = arith.constant 0 : index
      %c0_43 = arith.constant 0 : index
      %59 = vector.load %arg12[%c0_41, %c0_42, %c0_43] : memref<1x16x256xf32, #tpu.memory_space<vmem>>, vector<1x16x256xf32>
      %60 = vector.shape_cast %59 : vector<1x16x256xf32> to vector<16x256xf32>
      %61 = vector.shape_cast %58 : vector<16x256xf32> to vector<1x16x256xf32>
      tpu.vector_store %arg12[%c0_41, %c0_42, %c0_43], %61 {strides = array<i32>} : memref<1x16x256xf32, #tpu.memory_space<vmem>>, vector<1x16x256xf32>,
    } else {
    }
    return
  }
  func.func @transform_0(%arg0: i32, %arg1: i32, %arg2: i32) -> (i32, i32, i32) {
    %c0_i32 = arith.constant 0 : i32
    %c0_i32_0 = arith.constant 0 : i32
    return %arg0, %c0_i32, %arg1 : i32, i32, i32
  }
  func.func @transform_1(%arg0: i32, %arg1: i32, %arg2: i32) -> (i32, i32, i32) {
    %c0_i32 = arith.constant 0 : i32
    %c0_i32_0 = arith.constant 0 : i32
    return %arg0, %arg2, %c0_i32 : i32, i32, i32
  }
  func.func @transform_2(%arg0: i32, %arg1: i32, %arg2: i32) -> (i32, i32) {
    %c0_i32 = arith.constant 0 : i32
    %c0_i32_0 = arith.constant 0 : i32
    %c0_i32_1 = arith.constant 0 : i32
    return %c0_i32, %c0_i32_0 : i32, i32
  }
  func.func @transform_3(%arg0: i32, %arg1: i32, %arg2: i32) -> (i32, i32) {
    %c0_i32 = arith.constant 0 : i32
    %c0_i32_0 = arith.constant 0 : i32
    %c0_i32_1 = arith.constant 0 : i32
    return %c0_i32, %c0_i32_0 : i32, i32
  }
  func.func @transform_4(%arg0: i32, %arg1: i32, %arg2: i32) -> (i32, i32) {
    %c0_i32 = arith.constant 0 : i32
    %c0_i32_0 = arith.constant 0 : i32
    %c0_i32_1 = arith.constant 0 : i32
    return %c0_i32, %c0_i32_0 : i32, i32
  }
  func.func @transform_5(%arg0: i32, %arg1: i32, %arg2: i32) -> (i32, i32) {
    %c0_i32 = arith.constant 0 : i32
    %c0_i32_0 = arith.constant 0 : i32
    %c0_i32_1 = arith.constant 0 : i32
    return %c0_i32, %c0_i32_0 : i32, i32
  }
  func.func @transform_6(%arg0: i32, %arg1: i32, %arg2: i32) -> (i32, i32) {
    %c0_i32 = arith.constant 0 : i32
    %c0_i32_0 = arith.constant 0 : i32
    %c0_i32_1 = arith.constant 0 : i32
    return %c0_i32, %c0_i32_0 : i32, i32
  }
  func.func @transform_7(%arg0: i32, %arg1: i32, %arg2: i32) -> (i32, i32) {
    %c0_i32 = arith.constant 0 : i32
    %c0_i32_0 = arith.constant 0 : i32
    %c0_i32_1 = arith.constant 0 : i32
    return %c0_i32, %c0_i32_0 : i32, i32
  }
  func.func @transform_8(%arg0: i32, %arg1: i32, %arg2: i32) -> (i32, i32) {
    %c0_i32 = arith.constant 0 : i32
    %c0_i32_0 = arith.constant 0 : i32
    %c0_i32_1 = arith.constant 0 : i32
    return %c0_i32, %c0_i32_0 : i32, i32
  }
  func.func @transform_9(%arg0: i32, %arg1: i32, %arg2: i32) -> (i32, i32, i32) {
    %c0_i32 = arith.constant 0 : i32
    %c0_i32_0 = arith.constant 0 : i32
    return %arg0, %c0_i32, %arg1 : i32, i32, i32
  }
}

</mosaic_0001>

<bundles_post_ra>
// kernel: efficient_self_attention.1
= control target key start
LH: loop header
LB: loop body
LE: loop exit
PB: predicated region body
PF: predicated region fallthrough
CT: control target
= control target key end

     0   :  { %s2132_s11 = smov 0   ;;  %s2134_s12 = smov 0   ;;  %s3019_s0 = inlined_call_operand.vmem [shape: f32[2,16,256], index: 0, kind: input, shape index: {}]   ;;  %s3020_s1 = inlined_call_operand.vmem [shape: f32[2,256,16], index: 1, kind: input, shape index: {}]   ;;  %s3021_s2 = inlined_call_operand.vmem [shape: bf16[8,16], index: 2, kind: input, shape index: {}]   ;;  %s3022_s3 = inlined_call_operand.vmem [shape: f32[8,1], index: 3, kind: input, shape index: {}]   ;;  %s3023_s4 = inlined_call_operand.vmem [shape: bf16[8,16], index: 4, kind: input, shape index: {}]   ;;  %s3024_s5 = inlined_call_operand.vmem [shape: f32[1,8], index: 5, kind: input, shape index: {}]   ;;  %s3025_s6 = inlined_call_operand.vmem [shape: bf16[16,16], index: 6, kind: input, shape index: {}]   ;;  %s3026_s7 = inlined_call_operand.vmem [shape: f32[16,1], index: 7, kind: input, shape index: {}]   ;;  %s3027_s8 = inlined_call_operand.<no memory space> [shape: f32[1,1], index: 8, kind: input, shape index: {}]   ;;  %s3028_s9 = inlined_call_operand.vmem [shape: f32[2,16,256], index: 9, kind: output, shape index: {}]  }
   0x1   :  { %v14_v0 = vstv %s3027_s8  ;;  %s2136_s13 = smov 0  }
   0x2   :  { %15 = vst [vmem:[#allocation6] sm:$0x1] %v14_v0 }
   0x3 LB: > { %s40_s8 = sadd.s32 1, %s2069_s12  ;;  %p1757_p0 = scmp.ge.s32.totalorder %s2073_s13, 1  ;;  %s2073_s13 = sphi %s2136_s13, %s21_s13   ;;  %s2069_s12 = sphi %s2134_s12, %s3181_s12   ;;  %s2065_s11 = sphi %s2132_s11, %s3180_s11  }
   0x4   : > { %p42_p1 = scmp.ge.s32.totalorder %s40_s8, 2  ;;  %p334_p2 = scmp.lt.s32.totalorder %s2073_s13, 3 }
   0x6   : > { %s3183_s8 = smov (%p42_p1, %s40_s8), 0  ;;  %p335_p3 = pnand %p1757_p0, %p334_p2 }
   0x8   : > { %338 = sbr.rel (%p335_p3) target bundleno = 890 (0x37a), region = 56 }
   0xd   : > { %p388_p4 = scmp.lt.s32.totalorder %s2065_s11, 1  ;;  %v429_v1 = vld [vmem:[%s3022_s3] sm:$0xff]  ;;  %v2075_v2 = vmov 0   ;;  %v766_v3 = vld [vmem:[%s3026_s7 + $0x8] sm:$0xff]  ;;  %vm435_vm0 = vcmask 130048   ;;  %vm897_vm1 = vcmask 1043456  }
   0xe   : > { %471 = vmatprep.mubr.bf16.mxu0 %v2075_v2  ;;  %1916 = vset.pattern.permute.xlu0 %v2075_v2  ;;  %v765_v4 = vld [vmem:[%s3026_s7] sm:$0xff]  ;;  %vm848_vm2 = vcmask 64512  }
   0xf   : > { %s3185_s11 = smov (!%p388_p4, %s2065_s11), 1  ;;  %432 = vperm.xlu0 %1916, %v429_v1   ;;  %1917 = vset.pattern.permute.xlu1 %v2075_v2  ;;  %v542_v13 = vld [vmem:[%s3023_s4] sm:$0xf] }
  0x10   : > { %774 = vperm.xlu1 %1917, %v766_v3   ;;  %966 = vmatprep.mubr.bf16.mxu1 %v2075_v2  ;;  %s1803_s20 = sshll.u32 %s3185_s11, 5  ;;  %s1804_s21 = sshll.u32 %s3185_s11, 8  ;;  %v428_v16 = vld [vmem:[%s3021_s2] sm:$0xf]  ;;  %v600_v18 = vsel %vm435_vm0, %v542_v13, 0 }
  0x11   : > { %s2172_s24 = scalar_lea.vmem %s3019_s0, %s1803_s20  ;;  %s2177_s27 = scalar_lea.vmem %s3020_s1, %s1804_s21 }
  0x12   : > { %v423_v5 = vld [vmem:[%s2172_s24 + $0x8] sm:$0xff]  ;;  %v425_v6 = vld [vmem:[%s2172_s24 + $0x18] sm:$0xff]  ;;  %v422_v7 = vld [vmem:[%s2172_s24] sm:$0xff]  ;;  %s415_s22 = scalar_lea.vmem %s3028_s9, %s1803_s20 }
  0x13   : > { %769 = vperm.xlu0 %1916, %v765_v4   ;;  %v427_v8 = vpack.c.bf16 %v425_v6, %v423_v5  ;;  %v424_v9 = vld [vmem:[%s2172_s24 + $0x10] sm:$0xff]  ;;  %v494_v10 = vld [vmem:[%s2177_s27] sm:$0xff]  ;;  %v495_v11 = vld [vmem:[%s2177_s27 + $0x8] sm:$0xff] }
  0x14   : > { %v426_v12 = vpack.c.bf16 %v424_v9, %v422_v7  ;;  %v524_v14 = vld [vmem:[%s2177_s27 + $0xf0] sm:$0xff]  ;;  %v525_v15 = vld [vmem:[%s2177_s27 + $0xf8] sm:$0xff]  ;;  %v2193_v17 = vpack.c.bf16 %v495_v11, %v494_v10  ;;  %v498_v25 = vld [vmem:[%s2177_s27 + $0x20] sm:$0xff] }
  0x15   : > { %453 = vmatprep.subr.bf16.mxu0 %v427_v8  ;;  %v2197_v19 = vpack.c.bf16 %v525_v15, %v524_v14  ;;  %v508_v20 = vld [vmem:[%s2177_s27 + $0x70] sm:$0xff]  ;;  %v509_v21 = vld [vmem:[%s2177_s27 + $0x78] sm:$0xff]  ;;  %v499_v26 = vld [vmem:[%s2177_s27 + $0x28] sm:$0xff] }
  0x16   : > { %454 = vmatpush1.bf16.msra.mxu0 %v426_v12  ;;  %v496_v22 = vld [vmem:[%s2177_s27 + $0x10] sm:$0xff]  ;;  %v497_v23 = vld [vmem:[%s2177_s27 + $0x18] sm:$0xff]  ;;  %v533_v24 = vpack.c.bf16 %v509_v21, %v508_v20  ;;  %v522_v27 = vld [vmem:[%s2177_s27 + $0xe0] sm:$0xff]  ;;  %v528_v30 = vpack.c.bf16 %v499_v26, %v498_v25  ;;  %v552_v7 = vsel %vm435_vm0, %v2193_v17, 0 }
  0x17   : > { %1877 = vmatprep.subr.msk.bf16.mxu0 %vm435_vm0, %v542_v13  ;;  %v523_v28 = vld [vmem:[%s2177_s27 + $0xe8] sm:$0xff]  ;;  %v2212_v29 = vpack.c.bf16 %v497_v23, %v496_v22  ;;  %v506_v33 = vld [vmem:[%s2177_s27 + $0x60] sm:$0xff]  ;;  %v500_v35 = vld [vmem:[%s2177_s27 + $0x30] sm:$0xff] }
  0x18   : > { %v573_v31 = vsel %vm435_vm0, %v533_v24, 0  ;;  %v2215_v32 = vpack.c.bf16 %v523_v28, %v522_v27  ;;  %v507_v34 = vld [vmem:[%s2177_s27 + $0x68] sm:$0xff]  ;;  %v501_v36 = vld [vmem:[%s2177_s27 + $0x38] sm:$0xff]  ;;  %v502_v38 = vld [vmem:[%s2177_s27 + $0x40] sm:$0xff]  ;;  %v558_v4 = vsel %vm435_vm0, %v528_v30, 0 }
  0x19   : > { %1764 = vmatmul.mubr.msk.bf16.vlgmr.msra.gmra.mxu0 %vm435_vm0, %v428_v16  ;;  %v532_v37 = vpack.c.bf16 %v507_v34, %v506_v33  ;;  %v503_v39 = vld [vmem:[%s2177_s27 + $0x48] sm:$0xff]  ;;  %v520_v40 = vld [vmem:[%s2177_s27 + $0xd0] sm:$0xff]  ;;  %v521_v41 = vld [vmem:[%s2177_s27 + $0xd8] sm:$0xff]  ;;  %v529_v42 = vpack.c.bf16 %v501_v36, %v500_v35  ;;  %v555_v5 = vsel %vm435_vm0, %v2212_v29, 0 }
  0x1a   : > { %1842 = vmatpush3.bf16.xpose.msra.mxu0 %v600_v18  ;;  %1843 = vmatprep.mubr.msk.bf16.mxu0 %vm435_vm0, %v2193_v17  ;;  %v530_v43 = vpack.c.bf16 %v503_v39, %v502_v38  ;;  %v539_v45 = vpack.c.bf16 %v521_v41, %v520_v40  ;;  %v504_v46 = vld [vmem:[%s2177_s27 + $0x50] sm:$0xff]  ;;  %v505_v47 = vld [vmem:[%s2177_s27 + $0x58] sm:$0xff]  ;;  %v518_v49 = vld [vmem:[%s2177_s27 + $0xc0] sm:$0xff] }
  0x1b   : > { %1878 = vmatprep.subr.msk.bf16.mxu0 %vm435_vm0, %v2197_v19  ;;  %v570_v44 = vsel %vm435_vm0, %v532_v37, 0  ;;  %v531_v48 = vpack.c.bf16 %v505_v47, %v504_v46  ;;  %v519_v50 = vld [vmem:[%s2177_s27 + $0xc8] sm:$0xff]  ;;  %v510_v53 = vld [vmem:[%s2177_s27 + $0x80] sm:$0xff]  ;;  %v516_v55 = vld [vmem:[%s2177_s27 + $0xb0] sm:$0xff]  ;;  %v561_v3 = vsel %vm435_vm0, %v529_v42, 0 }
  0x1c   : > { %v538_v52 = vpack.c.bf16 %v519_v50, %v518_v49  ;;  %v511_v54 = vld [vmem:[%s2177_s27 + $0x88] sm:$0xff]  ;;  %v517_v56 = vld [vmem:[%s2177_s27 + $0xb8] sm:$0xff]  ;;  %v564_v58 = vsel %vm435_vm0, %v530_v43, 0  ;;  %v512_v60 = vld [vmem:[%s2177_s27 + $0x90] sm:$0xff] }
  0x1d   : > { %v567_v51 = vsel %vm435_vm0, %v531_v48, 0  ;;  %v534_v57 = vpack.c.bf16 %v511_v54, %v510_v53  ;;  %v537_v59 = vpack.c.bf16 %v517_v56, %v516_v55  ;;  %v513_v61 = vld [vmem:[%s2177_s27 + $0x98] sm:$0xff]  ;;  %v514_v62 = vld [vmem:[%s2177_s27 + $0xa0] sm:$0xff]  ;;  %v515_v63 = vld [vmem:[%s2177_s27 + $0xa8] sm:$0xff] }
  0x1e   : > { %v535_v0 = vpack.c.bf16 %v513_v61, %v512_v60  ;;  %v536_v1 = vpack.c.bf16 %v515_v63, %v514_v62  ;;  %v1918_v6 = vld [vmem:[%s3025_s6] sm:$0xff]  }
  0x1f   : > { %v2281_v23 = vld [vmem:[%s3024_s5] ss:$0 sm:$0xff] }
  0x21   : > { %1844 = vmatmul.mubr.msk.bf16.vlgmr.msra.gmra.mxu0 %vm435_vm0, %v2212_v29 }
  0x22   : > { %1824 = vmatpush3.bf16.xpose.msra.mxu0 %v573_v31  ;;  %1847 = vmatprep.mubr.msk.bf16.mxu0 %vm435_vm0, %v528_v30 }
  0x23   : > { %1879 = vmatprep.subr.msk.bf16.mxu0 %vm435_vm0, %v2215_v32 }
  0x29   : > { %1848 = vmatmul.mubr.msk.bf16.gmra.mxu0 %vm435_vm0, %v529_v42 }
  0x2a   : > { %1826 = vmatpush3.bf16.xpose.msra.mxu0 %v570_v44  ;;  %1851 = vmatprep.mubr.msk.bf16.mxu0 %vm435_vm0, %v530_v43 }
  0x2b   : > { %1880 = vmatprep.subr.msk.bf16.mxu0 %vm435_vm0, %v539_v45 }
  0x31   : > { %1852 = vmatmul.mubr.msk.bf16.gmra.mxu0 %vm435_vm0, %v531_v48 }
  0x32   : > { %1828 = vmatpush3.bf16.xpose.msra.mxu0 %v567_v51  ;;  %1855 = vmatprep.mubr.msk.bf16.mxu0 %vm435_vm0, %v532_v37 }
  0x33   : > { %1881 = vmatprep.subr.msk.bf16.mxu0 %vm435_vm0, %v538_v52 }
  0x39   : > { %1856 = vmatmul.mubr.msk.bf16.gmra.mxu0 %vm435_vm0, %v533_v24 }
  0x3a   : > { %1830 = vmatpush3.bf16.xpose.msra.mxu0 %v564_v58  ;;  %1859 = vmatprep.mubr.msk.bf16.mxu0 %vm435_vm0, %v534_v57 }
  0x3b   : > { %1882 = vmatprep.subr.msk.bf16.mxu0 %vm435_vm0, %v537_v59 }
  0x41   : > { %1860 = vmatmul.mubr.msk.bf16.gmra.mxu0 %vm435_vm0, %v535_v0 }
  0x42   : > { %1832 = vmatpush3.bf16.xpose.msra.mxu0 %v561_v3  ;;  %1863 = vmatprep.mubr.msk.bf16.mxu0 %vm435_vm0, %v536_v1 }
  0x43   : > { %1883 = vmatprep.subr.msk.bf16.mxu0 %vm435_vm0, %v536_v1 }
  0x49   : > { %1864 = vmatmul.mubr.msk.bf16.gmra.mxu0 %vm435_vm0, %v537_v59 }
  0x4a   : > { %1834 = vmatpush3.bf16.xpose.msra.mxu0 %v558_v4  ;;  %1867 = vmatprep.mubr.msk.bf16.mxu0 %vm435_vm0, %v538_v52 }
  0x4b   : > { %1884 = vmatprep.subr.msk.bf16.mxu0 %vm435_vm0, %v535_v0 }
  0x51   : > { %1868 = vmatmul.mubr.msk.bf16.gmra.mxu0 %vm435_vm0, %v539_v45 }
  0x52   : > { %1836 = vmatpush3.bf16.xpose.msra.mxu0 %v555_v5  ;;  %1871 = vmatprep.mubr.msk.bf16.mxu0 %vm435_vm0, %v2215_v32 }
  0x53   : > { %1885 = vmatprep.subr.msk.bf16.mxu0 %vm435_vm0, %v534_v57 }
  0x59   : > { %1872 = vmatmul.mubr.msk.bf16.gmra.mxu0 %vm435_vm0, %v2197_v19 }
  0x5a   : > { %1838 = vmatpush3.bf16.xpose.msra.mxu0 %v552_v7  ;;  %1839 = vmatprep.mubr.msk.bf16.mxu0 %vm435_vm0, %v1918_v6 }
  0x61   : > { %1840 = vmatmul.mubr.msk.bf16.vlgmr.msra.gmra.mxu0 %vm435_vm0, %v1918_v6 }
  0x62   : > { %936 = vmatprep.mubr.bf16.mxu0 %v2075_v2 }
  0x8a   : > { %v433_v8 = vpop.permute.xlu0 %432 }
  0xd9   : > { %v473_v9 = vpop.f32.mrf.mxu0 }
  0xda   : > { %v474_v10 = vadd.f32 %v473_v9, %v433_v8 }
  0xdb   : > { %v475_v11 = vpop.f32.mrf.mxu0 }
  0xdc   : > { %v480_v12 = vmul.f32 0.70710677, %v474_v10  ;;  %v476_v13 = vadd.f32 %v475_v11, %v433_v8 }
  0xdd   : > { %v477_v14 = vpop.f32.mrf.mxu0 }
  0xde   : > { %v846_v15 = vpack.c.bf16 %v480_v12, %v480_v12  ;;  %v481_v16 = vmul.f32 0.70710677, %v476_v13 }
  0xdf   : > { %v478_v17 = vpop.f32.mrf.mxu0 }
  0xe0   : > { %v847_v18 = vpack.c.bf16 %v481_v16, %v481_v16  ;;  %v899_v20 = vsel %vm897_vm1, %v846_v15, 0 }
  0xe1   : > { %v1845_v19 = vpop.f32.mrf.mxu0 }
  0xe2   : > { %1784 = vmatprep.subr.msk.bf16.mxu0 %vm897_vm1, %v847_v18  ;;  %1875 = vmatprep.subr.msk.bf16.mxu1 %vm897_vm1, %v847_v18  ;;  %v645_v35 = vadd.f32 %v1845_v19, %v2281_v23  ;;  %v770_v19 = vpop.permute.xlu0 %769 }
  0xe3   : > { %v636_v21 = vpop.f32.mrf.mxu0  ;;  %919 = vmatpush1.bf16.msra.mxu0 %v899_v20  ;;  %1876 = vmatpush1.bf16.msra.mxu1 %v899_v20 }
  0xe4   : > { %v637_v25 = vadd.f32 %v2281_v23, %v636_v21 }
  0xe5   : > { %v1846_v22 = vpop.f32.mrf.mxu0 }
  0xe6   : > { %v648_v31 = vadd.f32 %v1846_v22, %v2281_v23 }
  0xe7   : > { %v639_v24 = vpop.f32.mrf.mxu0 }
  0xe8   : > { %v640_v26 = vadd.f32 %v2281_v23, %v639_v24  ;;  %v829_v38 = vpack.c.bf16 %v648_v31, %v645_v35 }
  0xe9   : > { %v1849_v27 = vpop.f32.mrf.mxu0 }
  0xea   : > { %v828_v28 = vpack.c.bf16 %v640_v26, %v637_v25  ;;  %v661_v32 = vadd.f32 %v1849_v27, %v2281_v23  ;;  %v775_v25 = vpop.permute.xlu1 %774 }
  0xeb   : > { %v652_v29 = vpop.f32.mrf.mxu0 }
  0xec   : > { %1785 = vmatmul.mubr.msk.bf16.vlgmr.msra.gmra.mxu0 %vm848_vm2, %v828_v28  ;;  %v653_v43 = vadd.f32 %v2281_v23, %v652_v29 }
  0xed   : > { %v1850_v30 = vpop.f32.mrf.mxu0  ;;  %946 = vmatprep.mubr.bf16.mxu0 %v2075_v2 }
  0xee   : > { %v664_v33 = vadd.f32 %v1850_v30, %v2281_v23 }
  0xef   : > { %v655_v34 = vpop.f32.mrf.mxu0 }
  0xf0   : > { %v831_v36 = vpack.c.bf16 %v664_v33, %v661_v32  ;;  %v656_v41 = vadd.f32 %v2281_v23, %v655_v34 }
  0xf1   : > { %v1853_v37 = vpop.f32.mrf.mxu0 }
  0xf2   : > { %1788 = vmatmul.mubr.msk.bf16.vlgmr.msra.gmra.mxu1 %vm848_vm2, %v831_v36  ;;  %v830_v47 = vpack.c.bf16 %v656_v41, %v653_v43  ;;  %v677_v53 = vadd.f32 %v1853_v37, %v2281_v23 }
  0xf3   : > { %v668_v39 = vpop.f32.mrf.mxu0  ;;  %976 = vmatprep.mubr.bf16.mxu1 %v2075_v2 }
  0xf4   : > { %1786 = vmatmul.mubr.msk.bf16.gmra.mxu0 %vm848_vm2, %v829_v38  ;;  %v669_v44 = vadd.f32 %v2281_v23, %v668_v39 }
  0xf5   : > { %v1854_v40 = vpop.f32.mrf.mxu0  ;;  %956 = vmatprep.mubr.bf16.mxu0 %v2075_v2 }
  0xf6   : > { %v680_v51 = vadd.f32 %v1854_v40, %v2281_v23 }
  0xf7   : > { %v671_v42 = vpop.f32.mrf.mxu0 }
  0xf8   : > { %v672_v45 = vadd.f32 %v2281_v23, %v671_v42  ;;  %v833_v55 = vpack.c.bf16 %v680_v51, %v677_v53  ;;  %v3029_v51 = vlaneseq  ;;  %v2076_v53 = vmov -inf  }
  0xf9   : > { %v1857_v46 = vpop.f32.mrf.mxu0 }
  0xfa   : > { %v832_v48 = vpack.c.bf16 %v672_v45, %v669_v44  ;;  %v693_v1 = vadd.f32 %v1857_v46, %v2281_v23  ;;  %vm2352_vm3 = vcmp.lt.s32.totalorder %v3029_v51, 256 }
  0xfb   : > { %v684_v49 = vpop.f32.mrf.mxu0  ;;  %488 = vst.msk [vmem:[#allocation3] sm:$0x3] %vm2352_vm3, %v2076_v53 }
  0xfc   : > { %1787 = vmatmul.mubr.msk.bf16.gmra.mxu0 %vm848_vm2, %v830_v47  ;;  %1789 = vmatmul.mubr.msk.bf16.gmra.mxu1 %vm848_vm2, %v832_v48  ;;  %v685_v58 = vadd.f32 %v2281_v23, %v684_v49 }
  0xfd   : > { %v1858_v50 = vpop.f32.mrf.mxu0  ;;  %986 = vmatprep.mubr.bf16.mxu1 %v2075_v2 }
  0xfe   : > { %v696_v3 = vadd.f32 %v1858_v50, %v2281_v23 }
  0xff   : > { %v687_v52 = vpop.f32.mrf.mxu0 }
 0x100   : > { %v688_v59 = vadd.f32 %v2281_v23, %v687_v52  ;;  %v835_v6 = vpack.c.bf16 %v696_v3, %v693_v1  ;;  %v3085_v52 = vmov 0 }
 0x101   : > { %v1861_v54 = vpop.f32.mrf.mxu0  ;;  %v3086_v52 = vsel %vm2352_vm3, 4294967295, %v3085_v52 }
 0x102   : > { %v834_v62 = vpack.c.bf16 %v688_v59, %v685_v58  ;;  %v709_v16 = vadd.f32 %v1861_v54, %v2281_v23  ;;  %3087 = vst [vmem:[#allocation9_spill] sm:$0xff] %v3086_v52 }
 0x103   : > { %v700_v56 = vpop.f32.mrf.mxu0 }
 0x104   : > { %1790 = vmatmul.mubr.msk.bf16.gmra.mxu1 %vm848_vm2, %v833_v55  ;;  %v701_v9 = vadd.f32 %v2281_v23, %v700_v56 }
 0x105   : > { %v1862_v57 = vpop.f32.mrf.mxu0  ;;  %996 = vmatprep.mubr.bf16.mxu1 %v2075_v2 }
 0x106   : > { %v712_v17 = vadd.f32 %v1862_v57, %v2281_v23 }
 0x107   : > { %v703_v60 = vpop.f32.mrf.mxu0 }
 0x108   : > { %v704_v10 = vadd.f32 %v2281_v23, %v703_v60  ;;  %v837_v21 = vpack.c.bf16 %v712_v17, %v709_v16 }
 0x109   : > { %v1865_v61 = vpop.f32.mrf.mxu0 }
 0x10a   : > { %v836_v13 = vpack.c.bf16 %v704_v10, %v701_v9  ;;  %v725_v32 = vadd.f32 %v1865_v61, %v2281_v23 }
 0x10b   : > { %v716_v63 = vpop.f32.mrf.mxu0 }
 0x10c   : > { %1791 = vmatmul.mubr.msk.bf16.gmra.mxu1 %vm848_vm2, %v834_v62  ;;  %v717_v27 = vadd.f32 %v2281_v23, %v716_v63 }
 0x10d   : > { %v1866_v0 = vpop.f32.mrf.mxu0  ;;  %1006 = vmatprep.mubr.bf16.mxu1 %v2075_v2 }
 0x10e   : > { %v728_v33 = vadd.f32 %v1866_v0, %v2281_v23 }
 0x10f   : > { %v719_v4 = vpop.f32.mrf.mxu0 }
 0x110   : > { %v720_v28 = vadd.f32 %v2281_v23, %v719_v4  ;;  %v839_v34 = vpack.c.bf16 %v728_v33, %v725_v32 }
 0x111   : > { %v1869_v5 = vpop.f32.mrf.mxu0 }
 0x112   : > { %v838_v31 = vpack.c.bf16 %v720_v28, %v717_v27  ;;  %v741_v38 = vadd.f32 %v1869_v5, %v2281_v23 }
 0x113   : > { %v732_v7 = vpop.f32.mrf.mxu0 }
 0x114   : > { %1792 = vmatmul.mubr.msk.bf16.gmra.mxu1 %vm848_vm2, %v835_v6  ;;  %v733_v35 = vadd.f32 %v2281_v23, %v732_v7 }
 0x115   : > { %v1870_v8 = vpop.f32.mrf.mxu0  ;;  %1016 = vmatprep.mubr.bf16.mxu1 %v2075_v2 }
 0x116   : > { %v744_v39 = vadd.f32 %v1870_v8, %v2281_v23 }
 0x117   : > { %v735_v11 = vpop.f32.mrf.mxu0 }
 0x118   : > { %v736_v36 = vadd.f32 %v2281_v23, %v735_v11  ;;  %v841_v40 = vpack.c.bf16 %v744_v39, %v741_v38 }
 0x119   : > { %v1873_v12 = vpop.f32.mrf.mxu0 }
 0x11a   : > { %v840_v37 = vpack.c.bf16 %v736_v36, %v733_v35  ;;  %v757_v45 = vadd.f32 %v1873_v12, %v2281_v23 }
 0x11b   : > { %v748_v14 = vpop.f32.mrf.mxu0 }
 0x11c   : > { %1793 = vmatmul.mubr.msk.bf16.gmra.mxu1 %vm848_vm2, %v836_v13  ;;  %v749_v41 = vadd.f32 %v2281_v23, %v748_v14 }
 0x11d   : > { %v1874_v15 = vpop.f32.mrf.mxu0  ;;  %1026 = vmatprep.mubr.bf16.mxu1 %v2075_v2 }
 0x11e   : > { %v760_v46 = vadd.f32 %v1874_v15, %v2281_v23 }
 0x11f   : > { %v751_v18 = vpop.f32.mrf.mxu0 }
 0x120   : > { %v752_v42 = vadd.f32 %v2281_v23, %v751_v18  ;;  %v843_v49 = vpack.c.bf16 %v760_v46, %v757_v45 }
 0x121   : > { %v819_v20 = vpop.f32.mrf.mxu0 }
 0x122   : > { %v2320_v22 = vadd.f32 %v819_v20, %v770_v19  ;;  %v842_v43 = vpack.c.bf16 %v752_v42, %v749_v41 }
 0x123   : > { %v821_v24 = vpop.f32.mrf.mxu0 }
 0x124   : > { %3083 = vst [vmem:[#allocation7_spill] sm:$0xff] %v2320_v22  ;;  %1794 = vmatmul.mubr.msk.bf16.gmra.mxu1 %vm848_vm2, %v837_v21  ;;  %v822_v48 = vadd.f32 %v821_v24, %v770_v19 }
 0x125   : > { %v823_v26 = vpop.f32.mrf.mxu0  ;;  %1036 = vmatprep.mubr.bf16.mxu1 %v2075_v2 }
 0x126   : > { %v2326_v29 = vadd.f32 %v823_v26, %v775_v25 }
 0x127   : > { %v825_v44 = vpop.f32.mrf.mxu0 }
 0x128   : > { %3084 = vst [vmem:[#allocation8_spill] sm:$0xff] %v2326_v29  ;;  %v826_v47 = vadd.f32 %v825_v44, %v775_v25 }
 0x12a   : > { %v1498_v50 = vpack.c.bf16 %v826_v47, %v822_v48 }
 0x12c   : > { %1795 = vmatmul.mubr.msk.bf16.gmra.mxu1 %vm848_vm2, %v838_v31 }
 0x12d   : > { %1046 = vmatprep.mubr.bf16.mxu1 %v2075_v2 }
 0x134   : > { %1796 = vmatmul.mubr.msk.bf16.gmra.mxu1 %vm848_vm2, %v839_v34 }
 0x135   : > { %1056 = vmatprep.mubr.bf16.mxu1 %v2075_v2 }
 0x13c   : > { %1797 = vmatmul.mubr.msk.bf16.gmra.mxu1 %vm848_vm2, %v840_v37 }
 0x13d   : > { %1066 = vmatprep.mubr.bf16.mxu1 %v2075_v2 }
 0x144   : > { %1798 = vmatmul.mubr.msk.bf16.gmra.mxu1 %vm848_vm2, %v841_v40 }
 0x145   : > { %1076 = vmatprep.mubr.bf16.mxu1 %v2075_v2 }
 0x14c   : > { %1799 = vmatmul.mubr.msk.bf16.gmra.mxu1 %vm848_vm2, %v842_v43 }
 0x14d   : > { %1086 = vmatprep.mubr.bf16.mxu1 %v2075_v2  ;;  %v2077_v2 = vmov 0.0  }
 0x14e   : > { %489 = vst.msk [vmem:[#allocation4] sm:$0x3] %vm2352_vm3, %v2077_v2 }
 0x154   : > { %1800 = vmatmul.mubr.msk.bf16.gmra.mxu1 %vm848_vm2, %v843_v49 }
 0x155   : > { %1563 = vmatprep.mubr.bf16.mxu1 %v1498_v50 }
 0x1ac   : > { %v2386_v3 = vpop.f32.mrf.mxu0 }
 0x1ae   : > { %v2392_v6 = vpop.f32.mrf.mxu0 }
 0x1b0   : > { %v2398_v9 = vpop.f32.mrf.mxu0 }
 0x1b2   : > { %v2360_v23 = vpop.f32.mrf.mxu1  ;;  %v2404_v12 = vpop.f32.mrf.mxu0 }
 0x1b3   : > { %3088 = vst [vmem:[#allocation10_spill] sm:$0xff] %v2360_v23 }
 0x1b4   : > { %v2362_v54 = vpop.f32.mrf.mxu1  ;;  %v2410_v15 = vpop.f32.mrf.mxu0 }
 0x1b5   : > { %v1098_v40 = vmax.f32 %v2386_v3, %v2410_v15 }
 0x1b6   : > { %v2364_v55 = vpop.f32.mrf.mxu1  ;;  %v2416_v18 = vpop.f32.mrf.mxu0 }
 0x1b7   : > { %3089 = vst [vmem:[#allocation11_spill] sm:$0xff] %v2364_v55  ;;  %v1135_v44 = vmax.f32 %v2392_v6, %v2416_v18 }
 0x1b8   : > { %v2366_v56 = vpop.f32.mrf.mxu1  ;;  %v2422_v21 = vpop.f32.mrf.mxu0 }
 0x1b9   : > { %v1099_v41 = vmax.f32 %v2398_v9, %v2422_v21 }
 0x1ba   : > { %v2428_v26 = vpop.f32.mrf.mxu0 }
 0x1bb   : > { %v1136_v45 = vmax.f32 %v2404_v12, %v2428_v26 }
 0x1bc   : > { %v2368_v57 = vpop.f32.mrf.mxu1  ;;  %v2434_v31 = vpop.f32.mrf.mxu0 }
 0x1bd   : > { %v1100_v46 = vmax.f32 %v1098_v40, %v2434_v31 }
 0x1be   : > { %v2370_v58 = vpop.f32.mrf.mxu1  ;;  %v2440_v34 = vpop.f32.mrf.mxu0 }
 0x1bf   : > { %v1137_v49 = vmax.f32 %v1135_v44, %v2440_v34  ;;  %v1102_v2 = vmax.f32 %v1100_v46, %v2360_v23 }
 0x1c0   : > { %v2372_v59 = vpop.f32.mrf.mxu1  ;;  %v2446_v37 = vpop.f32.mrf.mxu0 }
 0x1c1   : > { %3090 = vst [vmem:[#allocation12_spill] sm:$0xff] %v2372_v59  ;;  %3097 = vst [vmem:[#allocation19_spill] sm:$0xff] %v2446_v37  ;;  %v1101_v47 = vmax.f32 %v1099_v41, %v2446_v37  ;;  %v1139_v22 = vmax.f32 %v1137_v49, %v2362_v54  ;;  %v1104_v41 = vmax.f32 %v1102_v2, %v2368_v57 }
 0x1c2   : > { %v2374_v60 = vpop.f32.mrf.mxu1  ;;  %v2456_v42 = vpop.f32.mrf.mxu0 }
 0x1c3   : > { %v1138_v50 = vmax.f32 %v1136_v45, %v2456_v42  ;;  %v1103_v30 = vmax.f32 %v1101_v47, %v2364_v55  ;;  %v1141_v45 = vmax.f32 %v1139_v22, %v2370_v58 }
 0x1c4   : > { %v2376_v61 = vpop.f32.mrf.mxu1 }
 0x1c5   : > { %v1140_v40 = vmax.f32 %v1138_v50, %v2366_v56  ;;  %v1105_v44 = vmax.f32 %v1103_v30, %v2372_v59  ;;  %v1106_v47 = vmax.f32 %v1104_v41, %v2376_v61 }
 0x1c6   : > { %v2378_v62 = vpop.f32.mrf.mxu1 }
 0x1c7   : > { %v1142_v46 = vmax.f32 %v1140_v40, %v2374_v60  ;;  %v1143_v49 = vmax.f32 %v1141_v45, %v2378_v62 }
 0x1c8   : > { %v2380_v63 = vpop.f32.mrf.mxu1 }
 0x1c9   : > { %3091 = vst [vmem:[#allocation13_spill] sm:$0xff] %v2380_v63  ;;  %v1107_v55 = vmax.f32 %v1105_v44, %v2380_v63 }
 0x1ca   : > { %v2382_v0 = vpop.f32.mrf.mxu1 }
 0x1cb   : > { %v1144_v50 = vmax.f32 %v1142_v46, %v2382_v0 }
 0x1cc   : > { %v2384_v1 = vpop.f32.mrf.mxu1 }
 0x1cd   : > { %v1108_v2 = vmax.f32 %v1106_v47, %v2384_v1 }
 0x1ce   : > { %v2388_v4 = vpop.f32.mrf.mxu1 }
 0x1cf   : > { %v1145_v22 = vmax.f32 %v1143_v49, %v2388_v4 }
 0x1d0   : > { %v2390_v5 = vpop.f32.mrf.mxu1 }
 0x1d1   : > { %3092 = vst [vmem:[#allocation14_spill] sm:$0xff] %v2390_v5  ;;  %v1109_v30 = vmax.f32 %v1107_v55, %v2390_v5 }
 0x1d2   : > { %v2394_v7 = vpop.f32.mrf.mxu1 }
 0x1d3   : > { %v1146_v40 = vmax.f32 %v1144_v50, %v2394_v7 }
 0x1d4   : > { %v2396_v8 = vpop.f32.mrf.mxu1 }
 0x1d5   : > { %v1110_v41 = vmax.f32 %v1108_v2, %v2396_v8 }
 0x1d6   : > { %v2400_v10 = vpop.f32.mrf.mxu1 }
 0x1d7   : > { %v1147_v45 = vmax.f32 %v1145_v22, %v2400_v10 }
 0x1d8   : > { %v2402_v11 = vpop.f32.mrf.mxu1 }
 0x1d9   : > { %3093 = vst [vmem:[#allocation15_spill] sm:$0xff] %v2402_v11  ;;  %v1111_v44 = vmax.f32 %v1109_v30, %v2402_v11 }
 0x1da   : > { %v2406_v13 = vpop.f32.mrf.mxu1 }
 0x1db   : > { %v1148_v46 = vmax.f32 %v1146_v40, %v2406_v13 }
 0x1dc   : > { %v2408_v14 = vpop.f32.mrf.mxu1 }
 0x1dd   : > { %v1112_v47 = vmax.f32 %v1110_v41, %v2408_v14 }
 0x1de   : > { %v2412_v16 = vpop.f32.mrf.mxu1 }
 0x1df   : > { %v1149_v49 = vmax.f32 %v1147_v45, %v2412_v16 }
 0x1e0   : > { %v2414_v17 = vpop.f32.mrf.mxu1 }
 0x1e1   : > { %3094 = vst [vmem:[#allocation16_spill] sm:$0xff] %v2414_v17  ;;  %v1113_v55 = vmax.f32 %v1111_v44, %v2414_v17 }
 0x1e2   : > { %v2418_v19 = vpop.f32.mrf.mxu1 }
 0x1e3   : > { %v1150_v50 = vmax.f32 %v1148_v46, %v2418_v19 }
 0x1e4   : > { %v2420_v20 = vpop.f32.mrf.mxu1 }
 0x1e5   : > { %v1114_v2 = vmax.f32 %v1112_v47, %v2420_v20 }
 0x1e6   : > { %v2424_v24 = vpop.f32.mrf.mxu1 }
 0x1e7   : > { %v1151_v22 = vmax.f32 %v1149_v49, %v2424_v24 }
 0x1e8   : > { %v2426_v25 = vpop.f32.mrf.mxu1 }
 0x1e9   : > { %3095 = vst [vmem:[#allocation17_spill] sm:$0xff] %v2426_v25  ;;  %v1115_v30 = vmax.f32 %v1113_v55, %v2426_v25 }
 0x1ea   : > { %v2430_v27 = vpop.f32.mrf.mxu1 }
 0x1eb   : > { %v1152_v40 = vmax.f32 %v1150_v50, %v2430_v27 }
 0x1ec   : > { %v2432_v28 = vpop.f32.mrf.mxu1 }
 0x1ed   : > { %v1116_v41 = vmax.f32 %v1114_v2, %v2432_v28 }
 0x1ee   : > { %v2436_v32 = vpop.f32.mrf.mxu1 }
 0x1ef   : > { %v1153_v45 = vmax.f32 %v1151_v22, %v2436_v32 }
 0x1f0   : > { %v2438_v33 = vpop.f32.mrf.mxu1 }
 0x1f1   : > { %3096 = vst [vmem:[#allocation18_spill] sm:$0xff] %v2438_v33  ;;  %v1117_v44 = vmax.f32 %v1115_v30, %v2438_v33 }
 0x1f2   : > { %v2442_v35 = vpop.f32.mrf.mxu1 }
 0x1f3   : > { %v1154_v46 = vmax.f32 %v1152_v40, %v2442_v35 }
 0x1f4   : > { %v2444_v36 = vpop.f32.mrf.mxu1 }
 0x1f5   : > { %v1118_v47 = vmax.f32 %v1116_v41, %v2444_v36 }
 0x1f6   : > { %v2448_v38 = vpop.f32.mrf.mxu1 }
 0x1f7   : > { %v1155_v49 = vmax.f32 %v1153_v45, %v2448_v38 }
 0x1f8   : > { %v2450_v39 = vpop.f32.mrf.mxu1 }
 0x1f9   : > { %3098 = vst [vmem:[#allocation20_spill] sm:$0xff] %v2450_v39  ;;  %v1119_v55 = vmax.f32 %v1117_v44, %v2450_v39 }
 0x1fa   : > { %v2458_v43 = vpop.f32.mrf.mxu1 }
 0x1fb   : > { %v1156_v50 = vmax.f32 %v1154_v46, %v2458_v43 }
 0x1fc   : > { %v2466_v48 = vpop.f32.mrf.mxu1 }
 0x1fd   : > { %v1120_v2 = vmax.f32 %v1118_v47, %v2466_v48 }
 0x1fe   : > { %v2470_v53 = vpop.f32.mrf.mxu1 }
 0x1ff   : > { %3099 = vst [vmem:[#allocation21_spill] sm:$0xff] %v2470_v53  ;;  %v1157_v22 = vmax.f32 %v1155_v49, %v2470_v53 }
 0x200   : > { %v2474_v51 = vpop.f32.mrf.mxu1 }
 0x201   : > { %3100 = vst [vmem:[#allocation22_spill] sm:$0xff] %v2474_v51  ;;  %v1121_v30 = vmax.f32 %v1119_v55, %v2474_v51 }
 0x202   : > { %v2478_v29 = vpop.f32.mrf.mxu1 }
 0x203   : > { %3101 = vst [vmem:[#allocation23_spill] sm:$0xff] %v2478_v29  ;;  %v1158_v40 = vmax.f32 %v1156_v50, %v2478_v29 }
 0x204   : > { %v2482_v37 = vpop.f32.mrf.mxu1 }
 0x205   : > { %3102 = vst [vmem:[#allocation24_spill] sm:$0xff] %v2482_v37  ;;  %v1122_v41 = vmax.f32 %v1120_v2, %v2482_v37 }
 0x206   : > { %v2488_v23 = vpop.f32.mrf.mxu1 }
 0x207   : > { %3103 = vst [vmem:[#allocation25_spill] sm:$0xff] %v2488_v23  ;;  %v1159_v45 = vmax.f32 %v1157_v22, %v2488_v23 }
 0x208   : > { %v2494_v59 = vpop.f32.mrf.mxu1 }
 0x209   : > { %3104 = vst [vmem:[#allocation26_spill] sm:$0xff] %v2494_v59  ;;  %v1123_v44 = vmax.f32 %v1121_v30, %v2494_v59 }
 0x20a   : > { %v2500_v63 = vpop.f32.mrf.mxu1 }
 0x20b   : > { %3105 = vst [vmem:[#allocation27_spill] sm:$0xff] %v2500_v63  ;;  %v1160_v46 = vmax.f32 %v1158_v40, %v2500_v63 }
 0x20c   : > { %v2506_v5 = vpop.f32.mrf.mxu1 }
 0x20d   : > { %3106 = vst [vmem:[#allocation28_spill] sm:$0xff] %v2506_v5  ;;  %v1124_v47 = vmax.f32 %v1122_v41, %v2506_v5 }
 0x20e   : > { %v2512_v11 = vpop.f32.mrf.mxu1 }
 0x20f   : > { %3107 = vst [vmem:[#allocation29_spill] sm:$0xff] %v2512_v11  ;;  %v1161_v49 = vmax.f32 %v1159_v45, %v2512_v11  ;;  %v2078_v45 = vmov 1966171168  }
 0x210   : > { %v2518_v17 = vpop.f32.mrf.mxu1  ;;  %v1176_v11 = vunpack.c.l.s4 %v2078_v45 }
 0x211   : > { %3108 = vst [vmem:[#allocation30_spill] sm:$0xff] %v2518_v17  ;;  %v1125_v55 = vmax.f32 %v1123_v44, %v2518_v17 }
 0x212   : > { %v2524_v25 = vpop.f32.mrf.mxu1 }
 0x213   : > { %3109 = vst [vmem:[#allocation31_spill] sm:$0xff] %v2524_v25  ;;  %v1162_v50 = vmax.f32 %v1160_v46, %v2524_v25 }
 0x214   : > { %v2530_v33 = vpop.f32.mrf.mxu1 }
 0x215   : > { %3110 = vst [vmem:[#allocation32_spill] sm:$0xff] %v2530_v33  ;;  %v1126_v2 = vmax.f32 %v1124_v47, %v2530_v33 }
 0x216   : > { %v2536_v39 = vpop.f32.mrf.mxu1 }
 0x217   : > { %v1163_v22 = vmax.f32 %v1161_v49, %v2536_v39 }
 0x218   : > { %v2542_v51 = vpop.f32.mrf.mxu1 }
 0x219   : > { %3111 = vst [vmem:[#allocation33_spill] sm:$0xff] %v2542_v51  ;;  %v1127_v30 = vmax.f32 %v1125_v55, %v2542_v51  ;;  %v1177_v55 = vunpack.c.0.s8 %v1176_v11  ;;  %v3112_v51 = vlaneseq }
 0x21a   : > { %v2548_v59 = vpop.f32.mrf.mxu1 }
 0x21b   : > { %v1128_v23 = vmax.f32 %v1126_v2, %v1127_v30  ;;  %v1164_v40 = vmax.f32 %v1162_v50, %v2548_v59  ;;  %v1179_v29 = vshrl.u32 %v3112_v51, 7  ;;  %v1607_v51 = vld [vmem:[#allocation6] sm:$0x1] }
 0x21c   : > { %1886 = vpush %v1607_v51 }
 0x21d   : > { %v1129_v41 = vrot.slane %v1128_v23, 4  ;;  %v1165_v5 = vmax.f32 %v1163_v22, %v1164_v40  ;;  %v2553_v30 = vsub.s32 %v1177_v55, %v1179_v29  ;;  %v2556_v22 = vld [vmem:[#allocation3] sm:$0x3] }
 0x21e   : > { %3114 = vst [vmem:[#allocation35_spill] sm:$0xff] %v2556_v22 }
 0x21f   : > { %v1130_v44 = vmax.f32 %v1128_v23, %v1129_v41  ;;  %v1166_v17 = vrot.slane %v1165_v5, 4  ;;  %3113 = vst [vmem:[#allocation34_spill] sm:$0xff] %v2553_v30 }
 0x221   : > { %v1131_v63 = vrot.slane %v1130_v44, 2  ;;  %v1167_v37 = vmax.f32 %v1165_v5, %v1166_v17  ;;  %v2567_v17 = vsub.s32 0, %v1179_v29 }
 0x223   : > { %v1132_v46 = vmax.f32 %v1130_v44, %v1131_v63  ;;  %v1168_v25 = vrot.slane %v1167_v37, 2  ;;  %3116 = vst [vmem:[#allocation37_spill] sm:$0xff] %v2567_v17 }
 0x225   : > { %v1133_v47 = vrot.slane %v1132_v46, 1  ;;  %v1169_v33 = vmax.f32 %v1167_v37, %v1168_v25  ;;  %v2569_v25 = vsub.s32 1, %v1179_v29 }
 0x227   : > { %v1170_v53 = vrot.slane %v1169_v33, 1  ;;  %v1134_v49 = vmax.f32 %v1132_v46, %v1133_v47  ;;  %3117 = vst [vmem:[#allocation38_spill] sm:$0xff] %v2569_v25 }
 0x229   : > { %v1171_v2 = vmax.f32 %v1169_v33, %v1170_v53 }
 0x22b   : > { %v1174_v50 = vcombine.low %v1134_v49, %v1171_v2  ;;  %v3118_v2 = vld [vmem:[#allocation19_spill] sm:$0xff] }
 0x22d   : > { %v1181_v23 = vrot.slane %v1174_v50, %v2553_v30 }
 0x22f   : > { %v1188_v5 = vrot.slane %v1181_v23, %v2553_v30 }
 0x231   : > { %v2560_v63 = vmax.f32 %v2556_v22, %v1188_v5  ;;  %v3119_v5 = vld [vmem:[#allocation10_spill] sm:$0xff] }
 0x233   : > { %3115 = vst [vmem:[#allocation36_spill] sm:$0xff] %v2560_v63  ;;  %1601 = vst.msk [vmem:[#allocation3] sm:$0x3] %vm2352_vm3, %v2560_v63  ;;  %v2573_v33 = vrot.slane %v2560_v63, %v2567_v17  ;;  %v2577_v37 = vrot.slane %v2560_v63, %v2569_v25 }
 0x235   : > { %v1205_v53 = vsub.f32 %v2386_v3, %v2573_v33  ;;  %v1206_v40 = vsub.f32 %v2392_v6, %v2577_v37  ;;  %v1207_v41 = vsub.f32 %v2398_v9, %v2573_v33  ;;  %v1208_v29 = vsub.f32 %v2404_v12, %v2577_v37 }
 0x236   : > { %v1209_v44 = vsub.f32 %v2410_v15, %v2573_v33  ;;  %v1210_v45 = vsub.f32 %v2416_v18, %v2577_v37  ;;  %v1211_v46 = vsub.f32 %v2422_v21, %v2573_v33  ;;  %v1212_v6 = vsub.f32 %v2428_v26, %v2577_v37 }
 0x237   : > { %v1269_v47 = vmul.f32 1.442695, %v1205_v53  ;;  %v1271_v3 = vmul.f32 1.442695, %v1206_v40  ;;  %v1273_v55 = vmul.f32 1.442695, %v1207_v41  ;;  %v1213_v9 = vsub.f32 %v2434_v31, %v2573_v33 }
 0x238   : > { %v1275_v49 = vmul.f32 1.442695, %v1208_v29  ;;  %v1277_v12 = vmul.f32 1.442695, %v1209_v44  ;;  %v1214_v15 = vsub.f32 %v2440_v34, %v2577_v37  ;;  %v1279_v18 = vmul.f32 1.442695, %v1210_v45 }
 0x239   : > { %1919 = vpow2.f32 %v1269_v47  ;;  %v1215_v21 = vsub.f32 %v3118_v2, %v2573_v33  ;;  %v1281_v50 = vmul.f32 1.442695, %v1211_v46  ;;  %v1216_v26 = vsub.f32 %v2456_v42, %v2577_v37  ;;  %v3120_v40 = vld [vmem:[#allocation11_spill] sm:$0xff]  ;;  %v3121_v47 = vld [vmem:[#allocation12_spill] sm:$0xff] }
 0x23a   : > { %1921 = vpow2.f32 %v1271_v3  ;;  %v1283_v23 = vmul.f32 1.442695, %v1212_v6  ;;  %v1217_v31 = vsub.f32 %v3119_v5, %v2573_v33  ;;  %v1285_v51 = vmul.f32 1.442695, %v1213_v9 }
 0x23b   : > { %1923 = vpow2.f32 %v1273_v55  ;;  %v1218_v34 = vsub.f32 %v2362_v54, %v2577_v37  ;;  %v1287_v53 = vmul.f32 1.442695, %v1214_v15  ;;  %v1219_v41 = vsub.f32 %v3120_v40, %v2573_v33 }
 0x23c   : > { %1925 = vpow2.f32 %v1275_v49  ;;  %v1289_v29 = vmul.f32 1.442695, %v1215_v21  ;;  %v1220_v42 = vsub.f32 %v2366_v56, %v2577_v37  ;;  %v1291_v44 = vmul.f32 1.442695, %v1216_v26 }
 0x23d   : > { %1927 = vpow2.f32 %v1277_v12  ;;  %v1221_v45 = vsub.f32 %v2368_v57, %v2573_v33  ;;  %v1222_v46 = vsub.f32 %v2370_v58, %v2577_v37  ;;  %v1293_v54 = vmul.f32 1.442695, %v1217_v31  ;;  %v3122_v58 = vld [vmem:[#allocation13_spill] sm:$0xff]  ;;  %v3126_v31 = vld [vmem:[#allocation15_spill] sm:$0xff] }
 0x23e   : > { %1929 = vpow2.f32 %v1279_v18  ;;  %v1223_v3 = vsub.f32 %v3121_v47, %v2573_v33  ;;  %v1224_v6 = vsub.f32 %v2374_v60, %v2577_v37  ;;  %v1295_v55 = vmul.f32 1.442695, %v1218_v34 }
 0x23f   : > { %1931 = vpow2.f32 %v1281_v50  ;;  %v1225_v56 = vsub.f32 %v2376_v61, %v2573_v33  ;;  %v1226_v49 = vsub.f32 %v2378_v62, %v2577_v37  ;;  %v1297_v57 = vmul.f32 1.442695, %v1219_v41  ;;  %v3124_v62 = vld [vmem:[#allocation14_spill] sm:$0xff] }
 0x240   : > { %1933 = vpow2.f32 %v1283_v23  ;;  %v1227_v9 = vsub.f32 %v3122_v58, %v2573_v33  ;;  %v1228_v12 = vsub.f32 %v2382_v0, %v2577_v37  ;;  %v1299_v15 = vmul.f32 1.442695, %v1220_v42 }
 0x241   : > { %1935 = vpow2.f32 %v1285_v51  ;;  %v1229_v60 = vsub.f32 %v2384_v1, %v2573_v33  ;;  %v1230_v18 = vsub.f32 %v2388_v4, %v2577_v37  ;;  %v1301_v61 = vmul.f32 1.442695, %v1221_v45 }
 0x242   : > { %1937 = vpow2.f32 %v1287_v53  ;;  %v1231_v21 = vsub.f32 %v3124_v62, %v2573_v33  ;;  %v1232_v50 = vsub.f32 %v2394_v7, %v2577_v37  ;;  %v1303_v0 = vmul.f32 1.442695, %v1222_v46 }
 0x243   : > { %1939 = vpow2.f32 %v1289_v29  ;;  %v1233_v1 = vsub.f32 %v2396_v8, %v2573_v33  ;;  %v1234_v4 = vsub.f32 %v2400_v10, %v2577_v37  ;;  %v1305_v23 = vmul.f32 1.442695, %v1223_v3  ;;  %v3127_v29 = vld [vmem:[#allocation16_spill] sm:$0xff]  ;;  %v3128_v3 = vld [vmem:[#allocation17_spill] sm:$0xff] }
 0x244   : > { %1941 = vpow2.f32 %v1291_v44  ;;  %v1235_v51 = vsub.f32 %v3126_v31, %v2573_v33  ;;  %v1236_v7 = vsub.f32 %v2406_v13, %v2577_v37  ;;  %v1307_v34 = vmul.f32 1.442695, %v1224_v6 }
 0x245   : > { %1943 = vpow2.f32 %v1293_v54  ;;  %v1237_v8 = vsub.f32 %v2408_v14, %v2573_v33  ;;  %v1238_v10 = vsub.f32 %v2412_v16, %v2577_v37  ;;  %v1309_v40 = vmul.f32 1.442695, %v1225_v56 }
 0x246   : > { %v2631_v2 = vpop.eup %1919  ;;  %1945 = vpow2.f32 %v1295_v55  ;;  %v1239_v42 = vsub.f32 %v3127_v29, %v2573_v33  ;;  %v1240_v13 = vsub.f32 %v2418_v19, %v2577_v37  ;;  %v1311_v44 = vmul.f32 1.442695, %v1226_v49 }
 0x247   : > { %3123 = vst [vmem:[#allocation19_spill] sm:$0xff] %v2631_v2  ;;  %v2637_v26 = vpop.eup %1921  ;;  %1947 = vpow2.f32 %v1297_v57  ;;  %v1241_v14 = vsub.f32 %v2420_v20, %v2573_v33  ;;  %v1242_v46 = vsub.f32 %v2424_v24, %v2577_v37  ;;  %v1313_v54 = vmul.f32 1.442695, %v1227_v9 }
 0x248   : > { %v2643_v5 = vpop.eup %1923  ;;  %1949 = vpow2.f32 %v1299_v15  ;;  %v1243_v6 = vsub.f32 %v3128_v3, %v2573_v33  ;;  %v1315_v55 = vmul.f32 1.442695, %v1228_v12  ;;  %v1317_v57 = vmul.f32 1.442695, %v1229_v60 }
 0x249   : > { %3125 = vst [vmem:[#allocation10_spill] sm:$0xff] %v2643_v5  ;;  %v2649_v53 = vpop.eup %1925  ;;  %1951 = vpow2.f32 %v1301_v61  ;;  %v1399_v56 = vadd.f32 %v2643_v5, %v2631_v2  ;;  %v1319_v61 = vmul.f32 1.442695, %v1230_v18  ;;  %v1323_v18 = vmul.f32 1.442695, %v1232_v50 }
 0x24a   : > { %v2655_v41 = vpop.eup %1927  ;;  %1953 = vpow2.f32 %v1303_v0  ;;  %v1436_v58 = vadd.f32 %v2649_v53, %v2637_v26  ;;  %v1325_v12 = vmul.f32 1.442695, %v1233_v1  ;;  %v1329_v11 = vmul.f32 1.442695, %v1235_v51 }
 0x24b   : > { %v2661_v45 = vpop.eup %1929  ;;  %1955 = vpow2.f32 %v1305_v23  ;;  %v1400_v62 = vadd.f32 %v2655_v41, %v1399_v56  ;;  %v1321_v23 = vmul.f32 1.442695, %v1231_v21  ;;  %v1331_v9 = vmul.f32 1.442695, %v1236_v7 }
 0x24c   : > { %v2667_v47 = vpop.eup %1931  ;;  %1957 = vpow2.f32 %v1307_v34  ;;  %v1437_v31 = vadd.f32 %v2661_v45, %v1436_v58  ;;  %v3129_v58 = vld [vmem:[#allocation18_spill] sm:$0xff]  ;;  %v1335_v7 = vmul.f32 1.442695, %v1238_v10  ;;  %v1339_v10 = vmul.f32 1.442695, %v1240_v13 }
 0x24d   : > { %v2673_v49 = vpop.eup %1933  ;;  %1959 = vpow2.f32 %v1309_v40  ;;  %v1327_v40 = vmul.f32 1.442695, %v1234_v4  ;;  %v1343_v13 = vmul.f32 1.442695, %v1242_v46  ;;  %v3135_v46 = vsub.f32 %v2430_v27, %v2577_v37  ;;  %v3150_v27 = vld [vmem:[#allocation32_spill] sm:$0xff]  ;;  %s1887_s18 = spop %1886 }
 0x24e   : > { %v2679_v15 = vpop.eup %1935  ;;  %1961 = vpow2.f32 %v1311_v44  ;;  %v1401_v44 = vadd.f32 %v2667_v47, %v1400_v62  ;;  %v1438_v21 = vadd.f32 %v2673_v49, %v1437_v31  ;;  %v1333_v62 = vmul.f32 1.442695, %v1237_v8 }
 0x24f   : > { %v2684_v0 = vpop.eup %1937  ;;  %1963 = vpow2.f32 %v1313_v54  ;;  %v1337_v8 = vmul.f32 1.442695, %v1239_v42  ;;  %v1341_v42 = vmul.f32 1.442695, %v1241_v14  ;;  %v1345_v14 = vmul.f32 1.442695, %v1243_v6 }
 0x250   : > { %v2689_v34 = vpop.eup %1939  ;;  %1965 = vpow2.f32 %v1315_v55  ;;  %v1402_v50 = vadd.f32 %v2679_v15, %v1401_v44  ;;  %v1439_v1 = vadd.f32 %v2684_v0, %v1438_v21  ;;  %v3130_v21 = vld [vmem:[#allocation20_spill] sm:$0xff]  ;;  %v3137_v6 = vsub.f32 %v2432_v28, %v2573_v33 }
 0x251   : > { %v2694_v56 = vpop.eup %1941  ;;  %1967 = vpow2.f32 %v1317_v57  ;;  %v3141_v28 = vsub.f32 %v3129_v58, %v2573_v33  ;;  %v3145_v58 = vsub.f32 %v2444_v36, %v2573_v33  ;;  %v3149_v36 = vsub.f32 %v3130_v21, %v2573_v33 }
 0x252   : > { %v2699_v54 = vpop.eup %1943  ;;  %1969 = vpow2.f32 %v1319_v61  ;;  %v1403_v4 = vadd.f32 %v2689_v34, %v1402_v50  ;;  %v1440_v51 = vadd.f32 %v2694_v56, %v1439_v1 }
 0x253   : > { %v2704_v55 = vpop.eup %1945  ;;  %1971 = vpow2.f32 %v1321_v23 }
 0x254   : > { %v2709_v57 = vpop.eup %1947  ;;  %1973 = vpow2.f32 %v1323_v18  ;;  %v1404_v18 = vadd.f32 %v2699_v54, %v1403_v4  ;;  %v1441_v1 = vadd.f32 %v2704_v55, %v1440_v51 }
 0x255   : > { %v2714_v61 = vpop.eup %1949  ;;  %1975 = vpow2.f32 %v1325_v12 }
 0x256   : > { %v2719_v23 = vpop.eup %1951  ;;  %1977 = vpow2.f32 %v1327_v40  ;;  %v1405_v40 = vadd.f32 %v2709_v57, %v1404_v18  ;;  %v1442_v51 = vadd.f32 %v2714_v61, %v1441_v1 }
 0x257   : > { %v2727_v50 = vpop.eup %1953  ;;  %1979 = vpow2.f32 %v1329_v11  ;;  %v3131_v11 = vld [vmem:[#allocation21_spill] sm:$0xff] }
 0x258   : > { %v2735_v60 = vpop.eup %1955  ;;  %1981 = vpow2.f32 %v1331_v9  ;;  %v3132_v9 = vld [vmem:[#allocation22_spill] sm:$0xff]  ;;  %v1406_v18 = vadd.f32 %v2719_v23, %v1405_v40  ;;  %v1443_v1 = vadd.f32 %v2727_v50, %v1442_v51  ;;  %v1347_v40 = vmul.f32 1.442695, %v3135_v46 }
 0x259   : > { %v2743_v4 = vpop.eup %1957  ;;  %1983 = vpow2.f32 %v1333_v62  ;;  %v3133_v62 = vld [vmem:[#allocation23_spill] sm:$0xff]  ;;  %v1349_v51 = vmul.f32 1.442695, %v3137_v6 }
 0x25a   : > { %v2751_v16 = vpop.eup %1959  ;;  %1985 = vpow2.f32 %v1335_v7  ;;  %v3134_v7 = vld [vmem:[#allocation24_spill] sm:$0xff]  ;;  %v1407_v12 = vadd.f32 %v2735_v60, %v1406_v18  ;;  %v1444_v44 = vadd.f32 %v2743_v4, %v1443_v1  ;;  %v3139_v18 = vsub.f32 %v2436_v32, %v2577_v37 }
 0x25b   : > { %v2759_v29 = vpop.eup %1961  ;;  %1987 = vpow2.f32 %v1337_v8  ;;  %v3136_v8 = vld [vmem:[#allocation25_spill] sm:$0xff]  ;;  %v1353_v1 = vmul.f32 1.442695, %v3141_v28  ;;  %v3143_v32 = vsub.f32 %v2442_v35, %v2577_v37  ;;  %v3147_v35 = vsub.f32 %v2448_v38, %v2577_v37 }
 0x25c   : > { %v2767_v19 = vpop.eup %1963  ;;  %1989 = vpow2.f32 %v1339_v10  ;;  %v3138_v10 = vld [vmem:[#allocation26_spill] sm:$0xff]  ;;  %v1351_v46 = vmul.f32 1.442695, %v3139_v18  ;;  %v1408_v31 = vadd.f32 %v2751_v16, %v1407_v12  ;;  %v1445_v6 = vadd.f32 %v2759_v29, %v1444_v44 }
 0x25d   : > { %v2775_v20 = vpop.eup %1965  ;;  %1991 = vpow2.f32 %v1341_v42  ;;  %v3140_v42 = vld [vmem:[#allocation27_spill] sm:$0xff]  ;;  %v1355_v12 = vmul.f32 1.442695, %v3143_v32  ;;  %v1357_v44 = vmul.f32 1.442695, %v3145_v58  ;;  %v3151_v38 = vsub.f32 %v2458_v43, %v2577_v37 }
 0x25e   : > { %v2783_v24 = vpop.eup %1967  ;;  %1993 = vpow2.f32 %v1343_v13  ;;  %v3142_v13 = vld [vmem:[#allocation28_spill] sm:$0xff]  ;;  %v1409_v18 = vadd.f32 %v2767_v19, %v1408_v31  ;;  %v1446_v28 = vadd.f32 %v2775_v20, %v1445_v6  ;;  %v1359_v31 = vmul.f32 1.442695, %v3147_v35 }
 0x25f   : > { %v1970_v3 = vpop.eup %1969  ;;  %1995 = vpow2.f32 %v1345_v14  ;;  %v3144_v14 = vld [vmem:[#allocation29_spill] sm:$0xff]  ;;  %v1361_v6 = vmul.f32 1.442695, %v3149_v36  ;;  %v1363_v35 = vmul.f32 1.442695, %v3151_v38 }
 0x260   : > { %v2797_v17 = vpop.eup %1971  ;;  %1997 = vpow2.f32 %v1347_v40  ;;  %v3146_v40 = vld [vmem:[#allocation30_spill] sm:$0xff]  ;;  %v1410_v32 = vadd.f32 %v2783_v24, %v1409_v18  ;;  %v1447_v58 = vadd.f32 %v1970_v3, %v1446_v28 }
 0x261   : > { %v1974_v25 = vpop.eup %1973  ;;  %1999 = vpow2.f32 %v1349_v51  ;;  %v3148_v51 = vld [vmem:[#allocation31_spill] sm:$0xff] }
 0x262   : > { %v1976_v30 = vpop.eup %1975  ;;  %2001 = vpow2.f32 %v1351_v46  ;;  %v1411_v18 = vadd.f32 %v2797_v17, %v1410_v32  ;;  %v1448_v21 = vadd.f32 %v1974_v25, %v1447_v58 }
 0x263   : > { %v1978_v63 = vpop.eup %1977  ;;  %2003 = vpow2.f32 %v1353_v1  ;;  %v3152_v1 = vsub.f32 %v2466_v48, %v2573_v33  ;;  %v3154_v48 = vsub.f32 %v3132_v9, %v2573_v33 }
 0x264   : > { %v1980_v22 = vpop.eup %1979  ;;  %2005 = vpow2.f32 %v1355_v12  ;;  %v3153_v12 = vsub.f32 %v3131_v11, %v2577_v37  ;;  %v1412_v5 = vadd.f32 %v1976_v30, %v1411_v18  ;;  %v1449_v58 = vadd.f32 %v1978_v63, %v1448_v21 }
 0x265   : > { %v1982_v2 = vpop.eup %1981  ;;  %2007 = vpow2.f32 %v1357_v44  ;;  %v1365_v52 = vmul.f32 1.442695, %v3152_v1  ;;  %v1513_v36 = vpack.c.bf16 %v1980_v22, %v1976_v30  ;;  %v1266_v44 = vsub.f32 %v2536_v39, %v2577_v37 }
 0x266   : > { %v2831_v28 = vpop.eup %1983  ;;  %2009 = vpow2.f32 %v1359_v31  ;;  %v1367_v46 = vmul.f32 1.442695, %v3153_v12  ;;  %v1514_v43 = vpack.c.bf16 %v1982_v2, %v1978_v63  ;;  %v1369_v32 = vmul.f32 1.442695, %v3154_v48 }
 0x267   : > { %v2836_v38 = vpop.eup %1985  ;;  %2011 = vpow2.f32 %v1361_v6  ;;  %v3155_v11 = vsub.f32 %v3133_v62, %v2577_v37  ;;  %v1413_v30 = vadd.f32 %v1980_v22, %v1412_v5  ;;  %v1512_v18 = vpack.c.bf16 %v1974_v25, %v1970_v3 }
 0x268   : > { %v2843_v1 = vpop.eup %1987  ;;  %2013 = vpow2.f32 %v1363_v35  ;;  %1531 = vmatprep.subr.bf16.mxu1 %v1514_v43  ;;  %v3156_v39 = vsub.f32 %v3134_v7, %v2573_v33  ;;  %v1450_v9 = vadd.f32 %v1982_v2, %v1449_v58  ;;  %v3157_v22 = vsub.f32 %v3136_v8, %v2577_v37 }
 0x269   : > { %v1371_v31 = vmul.f32 1.442695, %v3155_v11  ;;  %v2848_v12 = vpop.eup %1989  ;;  %2015 = vpow2.f32 %v1365_v52  ;;  %1532 = vmatpush1.bf16.msra.mxu1 %v1513_v36  ;;  %v1515_v63 = vpack.c.bf16 %v2843_v1, %v2831_v28  ;;  %v1414_v25 = vadd.f32 %v2831_v28, %v1413_v30 }
 0x26a   : > { %v1373_v6 = vmul.f32 1.442695, %v3156_v39  ;;  %v2855_v35 = vpop.eup %1991  ;;  %2017 = vpow2.f32 %v1367_v46  ;;  %v1375_v5 = vmul.f32 1.442695, %v3157_v22  ;;  %1533 = vmatprep.subr.bf16.mxu1 %v1512_v18  ;;  %v1516_v52 = vpack.c.bf16 %v2848_v12, %v2836_v38 }
 0x26b   : > { %v2863_v62 = vpop.eup %1993  ;;  %2019 = vpow2.f32 %v1369_v32  ;;  %v3158_v2 = vsub.f32 %v3138_v10, %v2573_v33  ;;  %v1451_v3 = vadd.f32 %v2836_v38, %v1450_v9  ;;  %v1511_v46 = vpack.c.bf16 %v2797_v17, %v2783_v24  ;;  %v3160_v10 = vld [vmem:[#allocation33_spill] sm:$0xff] }
 0x26c   : > { %v2871_v8 = vpop.eup %1995  ;;  %2021 = vpow2.f32 %v1371_v31  ;;  %v3159_v21 = vsub.f32 %v3140_v42, %v2577_v37  ;;  %v1415_v43 = vadd.f32 %v2843_v1, %v1414_v25  ;;  %v1510_v48 = vpack.c.bf16 %v2775_v20, %v2759_v29 }
 0x26d   : > { %v1377_v7 = vmul.f32 1.442695, %v3158_v2  ;;  %v2879_v32 = vpop.eup %1997  ;;  %v1267_v58 = vsub.f32 %v3160_v10, %v2573_v33  ;;  %2023 = vpow2.f32 %v1373_v6  ;;  %v3161_v17 = vsub.f32 %v3142_v13, %v2573_v33  ;;  %1534 = vmatpush1.bf16.msra.mxu1 %v1511_v46 }
 0x26e   : > { %v1379_v36 = vmul.f32 1.442695, %v3159_v21  ;;  %v1452_v11 = vadd.f32 %v2848_v12, %v1451_v3  ;;  %v2887_v42 = vpop.eup %1999  ;;  %v1268_v31 = vsub.f32 %v2548_v59, %v2577_v37  ;;  %2025 = vpow2.f32 %v1375_v5  ;;  %1535 = vmatprep.subr.bf16.mxu1 %v1510_v48 }
 0x26f   : > { %v1381_v24 = vmul.f32 1.442695, %v3161_v17  ;;  %v3162_v29 = vsub.f32 %v3144_v14, %v2577_v37  ;;  %v1416_v30 = vadd.f32 %v2855_v35, %v1415_v43  ;;  %v2895_v18 = vpop.eup %2001  ;;  %2027 = vpow2.f32 %v1377_v7 }
 0x270   : > { %v3163_v13 = vsub.f32 %v3146_v40, %v2573_v33  ;;  %v1453_v6 = vadd.f32 %v2863_v62, %v1452_v11  ;;  %v1509_v59 = vpack.c.bf16 %v2767_v19, %v2751_v16  ;;  %v2903_v9 = vpop.eup %2003  ;;  %2029 = vpow2.f32 %v1379_v36 }
 0x271   : > { %v1383_v20 = vmul.f32 1.442695, %v3162_v29  ;;  %v3164_v14 = vsub.f32 %v3148_v51, %v2577_v37  ;;  %v1417_v5 = vadd.f32 %v2871_v8, %v1416_v30  ;;  %v1508_v25 = vpack.c.bf16 %v2743_v4, %v2727_v50  ;;  %v2911_v2 = vpop.eup %2005 }
 0x272   : > { %v1385_v39 = vmul.f32 1.442695, %v3163_v13  ;;  %2031 = vpow2.f32 %v1381_v24  ;;  %v3165_v40 = vsub.f32 %v3150_v27, %v2573_v33  ;;  %v1454_v16 = vadd.f32 %v2879_v32, %v1453_v6  ;;  %1536 = vmatpush1.bf16.msra.mxu1 %v1509_v59  ;;  %v2917_v19 = vpop.eup %2007 }
 0x273   : > { %v1387_v22 = vmul.f32 1.442695, %v3164_v14  ;;  %2033 = vpow2.f32 %v1383_v20  ;;  %v1391_v37 = vmul.f32 1.442695, %v1266_v44  ;;  %v1418_v51 = vadd.f32 %v2887_v42, %v1417_v5  ;;  %1537 = vmatprep.subr.bf16.mxu1 %v1508_v25  ;;  %v2920_v3 = vpop.eup %2009 }
 0x274   : > { %v1389_v7 = vmul.f32 1.442695, %v3165_v40  ;;  %2035 = vpow2.f32 %v1385_v39  ;;  %v1393_v50 = vmul.f32 1.442695, %v1267_v58  ;;  %v1455_v4 = vadd.f32 %v2895_v18, %v1454_v16  ;;  %v2925_v27 = vpop.eup %2011 }
 0x275   : > { %v1507_v33 = vpack.c.bf16 %v2735_v60, %v2719_v23  ;;  %2037 = vpow2.f32 %v1387_v22  ;;  %v1395_v46 = vmul.f32 1.442695, %v1268_v31  ;;  %v1419_v21 = vadd.f32 %v2903_v9, %v1418_v51  ;;  %v2930_v36 = vpop.eup %2013 }
 0x276   : > { %v1506_v44 = vpack.c.bf16 %v2714_v61, %v2704_v55  ;;  %2039 = vpow2.f32 %v1389_v7  ;;  %v1456_v43 = vadd.f32 %v2911_v2, %v1455_v4  ;;  %v2933_v48 = vpop.eup %2015  ;;  %v1505_v55 = vpack.c.bf16 %v2709_v57, %v2699_v54 }
 0x277   : > { %1538 = vmatpush1.bf16.msra.mxu1 %v1507_v33  ;;  %2041 = vpow2.f32 %v1391_v37  ;;  %v1420_v60 = vadd.f32 %v2917_v19, %v1419_v21  ;;  %v2936_v23 = vpop.eup %2017  ;;  %v1504_v17 = vpack.c.bf16 %v2694_v56, %v2684_v0  ;;  %v1503_v57 = vpack.c.bf16 %v2689_v34, %v2679_v15 }
 0x278   : > { %1539 = vmatprep.subr.bf16.mxu1 %v1506_v44  ;;  %2043 = vpow2.f32 %v1393_v50  ;;  %v1457_v10 = vadd.f32 %v2920_v3, %v1456_v43  ;;  %v2941_v61 = vpop.eup %2019  ;;  %v1502_v0 = vpack.c.bf16 %v2673_v49, %v2661_v45  ;;  %v1501_v15 = vpack.c.bf16 %v2667_v47, %v2655_v41  ;;  %v3167_v41 = vld [vmem:[#allocation10_spill] sm:$0xff]  ;;  %v3168_v47 = vld [vmem:[#allocation19_spill] sm:$0xff] }
 0x279   : > { %2045 = vpow2.f32 %v1395_v46  ;;  %v1421_v58 = vadd.f32 %v2925_v27, %v1420_v60  ;;  %v2946_v24 = vpop.eup %2021  ;;  %v3166_v51 = vpack.c.bf16 %v2649_v53, %v2637_v26  ;;  %v3169_v60 = vpack.c.bf16 %v3167_v41, %v3168_v47 }
 0x27a   : > { %v1458_v11 = vadd.f32 %v2930_v36, %v1457_v10  ;;  %v2024_v31 = vpop.eup %2023 }
 0x27b   : > { %1540 = vmatpush1.bf16.msra.mxu1 %v1505_v55  ;;  %v1422_v29 = vadd.f32 %v2933_v48, %v1421_v58  ;;  %v2026_v20 = vpop.eup %2025 }
 0x27c   : > { %1541 = vmatprep.subr.bf16.mxu1 %v1504_v17  ;;  %v1459_v54 = vadd.f32 %v2936_v23, %v1458_v11  ;;  %v2028_v30 = vpop.eup %2027  ;;  %v3170_v17 = vld [vmem:[#allocation35_spill] sm:$0xff]  ;;  %v3171_v11 = vld [vmem:[#allocation36_spill] sm:$0xff] }
 0x27d   : > { %v1423_v13 = vadd.f32 %v2941_v61, %v1422_v29  ;;  %v2030_v56 = vpop.eup %2029  ;;  %v1525_v6 = vpack.c.bf16 %v2028_v30, %v2024_v31 }
 0x27e   : > { %v1460_v39 = vadd.f32 %v2946_v24, %v1459_v54  ;;  %v1526_v22 = vpack.c.bf16 %v2030_v56, %v2026_v20 }
 0x27f   : > { %1542 = vmatpush1.bf16.msra.mxu1 %v1503_v57  ;;  %v2032_v59 = vpop.eup %2031  ;;  %v1424_v14 = vadd.f32 %v2024_v31, %v1423_v13  ;;  %v3172_v31 = vsub.f32 %v3170_v17, %v3171_v11 }
 0x280   : > { %1543 = vmatprep.subr.bf16.mxu1 %v1502_v0  ;;  %v2034_v5 = vpop.eup %2033  ;;  %v1461_v25 = vadd.f32 %v2026_v20, %v1460_v39 }
 0x281   : > { %v2036_v34 = vpop.eup %2035  ;;  %v1425_v40 = vadd.f32 %v2028_v30, %v1424_v14  ;;  %v1192_v29 = vmul.f32 1.442695, %v3172_v31  ;;  %v1635_v31 = vld [vmem:[%s2172_s24 + $0x10] sm:$0xff] }
 0x282   : > { %v2038_v7 = vpop.eup %2037  ;;  %v1462_v16 = vadd.f32 %v2030_v56, %v1461_v25  ;;  %v1527_v45 = vpack.c.bf16 %v2036_v34, %v2032_v59 }
 0x283   : > { %1544 = vmatpush1.bf16.msra.mxu1 %v1501_v15  ;;  %v2040_v49 = vpop.eup %2039  ;;  %v1426_v37 = vadd.f32 %v2032_v59, %v1425_v40  ;;  %v1528_v50 = vpack.c.bf16 %v2038_v7, %v2034_v5  ;;  %2047 = vpow2.f32 %v1192_v29  ;;  %v1524_v59 = vpack.c.bf16 %v2946_v24, %v2936_v23  ;;  %v1397_v24 = vld [vmem:[#allocation4] sm:$0x3] }
 0x284   : > { %1545 = vmatprep.subr.bf16.mxu1 %v3166_v51  ;;  %v2042_v4 = vpop.eup %2041  ;;  %v1463_v33 = vadd.f32 %v2034_v5, %v1462_v16  ;;  %v1523_v15 = vpack.c.bf16 %v2941_v61, %v2933_v48  ;;  %v1522_v40 = vpack.c.bf16 %v2930_v36, %v2920_v3  ;;  %v1521_v16 = vpack.c.bf16 %v2925_v27, %v2917_v19  ;;  %v3179_v51 = vld [vmem:[#allocation38_spill] sm:$0xff] }
 0x285   : > { %v2044_v46 = vpop.eup %2043  ;;  %v1427_v21 = vadd.f32 %v2036_v34, %v1426_v37  ;;  %v1519_v3 = vpack.c.bf16 %v2903_v9, %v2887_v42  ;;  %v1518_v36 = vpack.c.bf16 %v2879_v32, %v2863_v62  ;;  %v3175_v42 = vld [vmem:[#allocation8_spill] sm:$0xff]  ;;  %v3176_v62 = vld [vmem:[#allocation7_spill] sm:$0xff] }
 0x286   : > { %v2046_v44 = vpop.eup %2045  ;;  %v1464_v43 = vadd.f32 %v2038_v7, %v1463_v33  ;;  %v1529_v10 = vpack.c.bf16 %v2044_v46, %v2040_v49  ;;  %v3177_v32 = vpack.c.bf16 %v3175_v42, %v3176_v62 }
 0x287   : > { %1546 = vmatpush1.bf16.msra.mxu1 %v3169_v60  ;;  %v1428_v55 = vadd.f32 %v2040_v49, %v1427_v21  ;;  %v1530_v58 = vpack.c.bf16 %v2046_v44, %v2042_v4  ;;  %v1633_v21 = vld [vmem:[%s2172_s24] sm:$0xff]  ;;  %v1634_v60 = vld [vmem:[%s2172_s24 + $0x8] sm:$0xff] }
 0x288   : > { %v1465_v26 = vadd.f32 %v2042_v4, %v1464_v43 }
 0x289   : > { %v1429_v53 = vadd.f32 %v2044_v46, %v1428_v55  ;;  %1547 = vmatprep.subr.bf16.mxu1 %v1530_v58 }
 0x28a   : > { %v1466_v20 = vadd.f32 %v2046_v44, %v1465_v26 }
 0x28b   : > { %1548 = vmatpush2.bf16.msra.mxu1 %v1529_v10  ;;  %v1430_v54 = vrot.slane %v1429_v53, 4 }
 0x28c   : > { %1549 = vmatprep.subr.bf16.mxu1 %v1528_v50  ;;  %v1467_v57 = vrot.slane %v1466_v20, 4 }
 0x28d   : > { %v1431_v30 = vadd.f32 %v1430_v54, %v1429_v53 }
 0x28e   : > { %v1468_v13 = vadd.f32 %v1467_v57, %v1466_v20  ;;  %v1636_v20 = vld [vmem:[%s2172_s24 + $0x18] sm:$0xff] }
 0x28f   : > { %1550 = vmatpush2.bf16.msra.mxu1 %v1527_v45  ;;  %v1432_v0 = vrot.slane %v1431_v30, 2  ;;  %v3173_v45 = vld [vmem:[#allocation34_spill] sm:$0xff] }
 0x290   : > { %1551 = vmatprep.subr.bf16.mxu1 %v1526_v22  ;;  %v1469_v56 = vrot.slane %v1468_v13, 2  ;;  %v2048_v23 = vpop.eup %2047 }
 0x291   : > { %v1433_v39 = vadd.f32 %v1432_v0, %v1431_v30  ;;  %v1398_v48 = vmul.f32 %v2048_v23, %v1397_v24 }
 0x292   : > { %v1470_v14 = vadd.f32 %v1469_v56, %v1468_v13 }
 0x293   : > { %1552 = vmatpush2.bf16.msra.mxu1 %v1525_v6  ;;  %v1434_v5 = vrot.slane %v1433_v39, 1  ;;  %v1520_v6 = vpack.c.bf16 %v2911_v2, %v2895_v18  ;;  %v1517_v18 = vpack.c.bf16 %v2871_v8, %v2855_v35  ;;  %v3178_v2 = vld [vmem:[#allocation37_spill] sm:$0xff]  ;;  %v1586_v35 = vrot.slane %v2048_v23, %v3179_v51 }
 0x294   : > { %1553 = vmatprep.subr.bf16.mxu1 %v1524_v59  ;;  %v1471_v25 = vrot.slane %v1470_v14, 1  ;;  %v1582_v27 = vrot.slane %v2048_v23, %v3178_v2 }
 0x295   : > { %v1435_v34 = vadd.f32 %v1434_v5, %v1433_v39  ;;  %v1590_v1 = vmul.f32 0.0, %v1586_v35 }
 0x296   : > { %v1472_v7 = vadd.f32 %v1471_v25, %v1470_v14  ;;  %v1589_v50 = vmul.f32 0.0, %v1582_v27 }
 0x297   : > { %1554 = vmatpush2.bf16.msra.mxu1 %v1523_v15 }
 0x298   : > { %1555 = vmatprep.subr.bf16.mxu1 %v1522_v40  ;;  %v1475_v22 = vcombine.low %v1435_v34, %v1472_v7 }
 0x29a   : > { %v1482_v49 = vrot.slane %v1475_v22, %v3173_v45 }
 0x29b   : > { %1556 = vmatpush2.bf16.msra.mxu1 %v1521_v16 }
 0x29c   : > { %1557 = vmatprep.subr.bf16.mxu1 %v1520_v6  ;;  %v1489_v61 = vrot.slane %v1482_v49, %v3173_v45 }
 0x29e   : > { %v1491_v37 = vadd.f32 %v1489_v61, %v1398_v48 }
 0x29f   : > { %1558 = vmatpush2.bf16.msra.mxu1 %v1519_v3 }
 0x2a0   : > { %1559 = vmatprep.subr.bf16.mxu1 %v1518_v36  ;;  %1496 = vst.msk [vmem:[#allocation4] sm:$0x3] %vm2352_vm3, %v1491_v37 }
 0x2a3   : > { %1560 = vmatpush2.bf16.msra.mxu1 %v1517_v18 }
 0x2a4   : > { %1561 = vmatprep.subr.bf16.mxu1 %v1516_v52  ;;  %v1628_v52 = vstv %s1887_s18 }
 0x2a7   : > { %1562 = vmatpush2.bf16.msra.mxu1 %v1515_v63  ;;  %v1605_v9 = vld [vmem:[#allocation4] sm:$0x3] }
 0x2a8   : > { %2049 = vrcp.f32 %v1605_v9 }
 0x2aa   : > { %1564 = vmatmul.mubr.bf16.vlgmr.msra.gmra.mxu1 %v3177_v32 }
 0x2b5   : > { %v2050_v8 = vpop.eup %2049 }
 0x2b6   : > { %v1617_v28 = vrot.slane %v2050_v8, %v3178_v2  ;;  %v1621_v46 = vrot.slane %v2050_v8, %v3179_v51 }
 0x36a   : > { %v1565_v38 = vpop.f32.mrf.mxu1 }
 0x36b   : > { %v1593_v12 = vadd.f32 %v1589_v50, %v1565_v38 }
 0x36c   : > { %v1567_v63 = vpop.f32.mrf.mxu1 }
 0x36d   : > { %v1624_v4 = vmul.f32 %v1617_v28, %v1593_v12  ;;  %v1594_v33 = vadd.f32 %v1590_v1, %v1567_v63 }
 0x36e   : > { %v1569_v44 = vpop.f32.mrf.mxu1 }
 0x36f   : > { %v1625_v43 = vmul.f32 %v1621_v46, %v1594_v33  ;;  %v1629_v41 = vmul.f32 %v1628_v52, %v1624_v4  ;;  %v1595_v47 = vadd.f32 %v1589_v50, %v1569_v44 }
 0x370   : > { %v1571_v10 = vpop.f32.mrf.mxu1 }
 0x371   : > { %v1630_v55 = vmul.f32 %v1628_v52, %v1625_v43  ;;  %v1637_v58 = vadd.f32 %v1633_v21, %v1629_v41  ;;  %v1626_v17 = vmul.f32 %v1617_v28, %v1595_v47  ;;  %v1596_v11 = vadd.f32 %v1590_v1, %v1571_v10 }
 0x373   : > { %v1638_v29 = vadd.f32 %v1634_v60, %v1630_v55  ;;  %1641 = vst [vmem:[%s415_s22] sm:$0xff] %v1637_v58  ;;  %v1631_v26 = vmul.f32 %v1628_v52, %v1626_v17  ;;  %v1627_v53 = vmul.f32 %v1621_v46, %v1596_v11 }
 0x375   : > { %1642 = vst [vmem:[%s415_s22 + $0x8] sm:$0xff] %v1638_v29  ;;  %v1639_v54 = vadd.f32 %v1635_v31, %v1631_v26  ;;  %v1632_v57 = vmul.f32 %v1628_v52, %v1627_v53 }
 0x377   : > { %1643 = vst [vmem:[%s415_s22 + $0x10] sm:$0xff] %v1639_v54  ;;  %v1640_v30 = vadd.f32 %v1636_v20, %v1632_v57 }
 0x379   : > { %1644 = vst [vmem:[%s415_s22 + $0x18] sm:$0xff] %v1640_v30 }
 0x37a PF: > { %s21_s13 = sadd.s32 1, %s2073_s13   ;;  %s3180_s11 = smov %s2069_s12 }
 0x37b   : > { %p18_p5 = scmp.ge.s32.totalorder %s21_s13, 4   ;;  %s3181_s12 = smov %s3183_s8 }
 0x37d   :  { %20 = sbr.rel (!%p18_p5) target bundleno = 3 (0x3), region = 97 }

</bundles_post_ra>
